<compile_context>
chip_gen: v7x
topology: tpu7x:2x2x1
jax: 0.10.0
libtpu: 0.0.40
codegen_flags: <defaults>
</compile_context>

<pallas_src>
import math
import jax
import jax.numpy as jnp
from jax.experimental import pallas as pl
from jax.experimental.pallas import tpu as pltpu


# ------------------------- fused BiLSTM + MLP kernel -------------------------
def fused_bilstm_mlp_kernel(gx_ref,            # (T, B, 8H) f32  pre-packed gate inputs (biases folded)
                            wblk_ref,          # (2H, 8H)   f32  block-diag recurrent weight
                            w1_ref, b1_ref,    # (T, 2H, 512) bf16, (1, 512) f32
                            w2_ref, b2_ref,    # (512, 512)  bf16, (1, 512) f32
                            w3_ref, b3_ref,    # (512, C)    bf16, (1, C)   f32
                            out_ref):          # (B, C) f32
    T, B, _ = gx_ref.shape
    H2 = wblk_ref.shape[0]                     # 2H (fwd|bwd concatenated hidden)
    F1 = w1_ref.shape[2]                       # 512

    wblk = wblk_ref[...]

    h = jnp.zeros((B, H2), jnp.float32)        # [h_fwd | h_bwd]
    c = jnp.zeros((B, H2), jnp.float32)        # [c_fwd | c_bwd]
    acc = jnp.zeros((B, F1), jnp.float32)      # fc1 accumulator

    # Fully unrolled recurrence (T static).  Step s: fwd processes time s, bwd
    # processes time T-1-s (gx is pre-packed that way).  One 128-lane recurrent
    # matmul + one sigmoid + two tanh per step; fc1 MXU work hides under the
    # otherwise-idle recurrence.
    for s in range(T):
        g = gx_ref[s] + jnp.dot(h, wblk, preferred_element_type=jnp.float32)  # (B, 8H)
        sg = jax.nn.sigmoid(g)                 # one EUP push, full width
        th = jnp.tanh(g)                       # one EUP push, full width
        i_g = sg[:, 0 * H2:1 * H2]             # [i_f | i_b]
        f_g = sg[:, 1 * H2:2 * H2]             # [f_f | f_b]
        g_g = th[:, 2 * H2:3 * H2]             # [g_f | g_b]
        o_g = sg[:, 3 * H2:4 * H2]             # [o_f | o_b]
        c = f_g * c + i_g * g_g
        h = o_g * jnp.tanh(c)
        acc = acc + jnp.dot(h.astype(jnp.bfloat16), w1_ref[s],
                            preferred_element_type=jnp.float32)

    # TODO(synk): nn.Dropout implemented as identity (eval mode); training-mode
    # stochastic mask omitted.

    h1 = jnp.maximum(acc + b1_ref[...], 0.0)
    h2 = jnp.maximum(
        jnp.dot(h1.astype(jnp.bfloat16), w2_ref[...],
                preferred_element_type=jnp.float32) + b2_ref[...], 0.0)
    out_ref[...] = (
        jnp.dot(h2.astype(jnp.bfloat16), w3_ref[...],
                preferred_element_type=jnp.float32) + b3_ref[...])


_VMEM = pl.BlockSpec(memory_space=pltpu.MemorySpace.VMEM)


def fused_forward_pallas(gx_packed, params):
    """gx_packed: (T, B, 8H) f32 -> logits (B, numclass) f32. One pallas_call."""
    _, B, _ = gx_packed.shape
    C = params["w3"].shape[1]
    return pl.pallas_call(
        fused_bilstm_mlp_kernel,
        out_shape=jax.ShapeDtypeStruct((B, C), jnp.float32),
        in_specs=[_VMEM] * 8,
        out_specs=_VMEM,
        compiler_params=pltpu.CompilerParams(vmem_limit_bytes=32 * 1024 * 1024),
    )(gx_packed,
      params["wblk"],
      params["w1p"], params["b1"],
      params["w2"], params["b2"],
      params["w3"], params["b3"])


# ----------------------------- parameter init --------------------------------
def init_params(key, vocab_size, ntoken, d_emb, d_hid, numclass):
    ks = jax.random.split(key, 16)
    H, T = d_hid, ntoken
    s_lstm = 1.0 / math.sqrt(d_hid)

    def u(k, shape, s):
        return jax.random.uniform(k, shape, jnp.float32, minval=-s, maxval=s)

    # --- raw PyTorch-equivalent parameters ---
    embed = jax.random.normal(ks[0], (vocab_size, d_emb), jnp.float32)  # nn.Embedding N(0,1)
    wih_f = u(ks[1], (d_emb, 4 * H), s_lstm)       # (E, 4H), gate order i,f,g,o
    whh_f = u(ks[2], (H, 4 * H), s_lstm)
    b_f = u(ks[3], (4 * H,), s_lstm) + u(ks[4], (4 * H,), s_lstm)       # b_ih + b_hh
    wih_b = u(ks[5], (d_emb, 4 * H), s_lstm)
    whh_b = u(ks[6], (H, 4 * H), s_lstm)
    b_b = u(ks[7], (4 * H,), s_lstm) + u(ks[8], (4 * H,), s_lstm)

    F = T * 2 * H
    s1, s2, s3 = 1.0 / math.sqrt(F), 1.0 / math.sqrt(512), 1.0 / math.sqrt(512)
    w1 = u(ks[9], (F, 512), s1)
    b1 = u(ks[10], (1, 512), s1)
    w2 = u(ks[11], (512, 512), s2)
    b2 = u(ks[12], (1, 512), s2)
    w3 = u(ks[13], (512, numclass), s3)
    b3 = u(ks[14], (1, numclass), s3)

    # --- kernel-ready packed parameters ---
    # (1) Fold embedding @ W_ih (+ biases) into a gatherable (vocab, 8H) table.
    #     Columns interleaved per gate: [i_f,i_b,f_f,f_b,g_f,g_b,o_f,o_b].
    tf = (embed @ wih_f + b_f).reshape(vocab_size, 4, H)
    tb = (embed @ wih_b + b_b).reshape(vocab_size, 4, H)
    gate_table = jnp.stack([tf, tb], axis=2).reshape(vocab_size, 8 * H)

    # (2) Block-diagonal recurrent weight (2H, 8H), same interleaved columns,
    #     rows = [h_fwd | h_bwd].
    z = jnp.zeros((H, 4, H), jnp.float32)
    top = jnp.stack([whh_f.reshape(H, 4, H), z], axis=2)   # (H, 4, 2, H)
    bot = jnp.stack([z, whh_b.reshape(H, 4, H)], axis=2)   # (H, 4, 2, H)
    wblk = jnp.concatenate([top, bot], axis=0).reshape(2 * H, 8 * H)

    # (3) fc1 regrouped per recurrence step: step s consumes [h_fwd(s) | h_bwd(T-1-s)].
    w1_r = w1.reshape(T, 2, H, 512)
    w1p = jnp.concatenate([w1_r[:, 0], w1_r[::-1, 1]], axis=1)  # (T, 2H, 512)

    return {
        "gate_table": gate_table,                  # f32 (vocab, 8H)
        "wblk": wblk,                              # f32 (2H, 8H) - tiny, keep f32 for recurrence precision
        "w1p": w1p.astype(jnp.bfloat16),
        "b1": b1,
        "w2": w2.astype(jnp.bfloat16),
        "b2": b2,
        "w3": w3.astype(jnp.bfloat16),
        "b3": b3,
    }


# ------------------------------- forward pass ---------------------------------
@jax.jit
def bilstm_model_forward(x_ids, params):
    """x_ids: (B, T) int32 token ids -> logits (B, numclass)."""
    table = params["gate_table"]
    B, T = x_ids.shape
    H8 = table.shape[1]
    H = H8 // 8

    # One tiny gather (replaces the old embedding gather) + lane-masked select
    # to pair fwd gates of token t with bwd gates of token T-1-t, time-major.
    g_tok = table[x_ids]                                   # (B, T, 8H)
    g_rev = g_tok[:, ::-1, :]                              # token T-1-t
    fwd_lane = (jnp.arange(H8) // H) % 2 == 0              # interleaved layout mask
    gx_packed = jnp.where(fwd_lane, g_tok, g_rev)          # (B, T, 8H)
    gx_packed = jnp.transpose(gx_packed, (1, 0, 2))        # (T, B, 8H)
    return fused_forward_pallas(gx_packed, params)


# ----------------------------------- main --------------------------------------
if __name__ == "__main__":
    # Small shapes consistent with the module (8H = 128 lanes at d_hid=16)
    vocab_size = 50
    ntoken = 8        # sequence length (n_token)
    d_emb = 32
    d_hid = 16
    numclass = 15
    batch = 2

    key = jax.random.PRNGKey(0)
    k_params, k_ids = jax.random.split(key)
    params = init_params(k_params, vocab_size, ntoken, d_emb, d_hid, numclass)
    x_ids = jax.random.randint(k_ids, (batch, ntoken), 0, vocab_size, dtype=jnp.int32)

    logits = bilstm_model_forward(x_ids, params)
    jax.block_until_ready(logits)
    assert logits.shape == (batch, numclass)
    assert bool(jnp.all(jnp.isfinite(logits)))
    print("KERNEL_OK")
</pallas_src>

<mosaic_0001>
module attributes {stable_mosaic.version = 11 : i64} {
  func.func @fused_bilstm_mlp_kernel(%arg0: memref<8x2x128xf32, #tpu.memory_space<vmem>>, %arg1: memref<32x128xf32, #tpu.memory_space<vmem>>, %arg2: memref<8x32x512xbf16, #tpu.memory_space<vmem>>, %arg3: memref<1x512xf32, #tpu.memory_space<vmem>>, %arg4: memref<512x512xbf16, #tpu.memory_space<vmem>>, %arg5: memref<1x512xf32, #tpu.memory_space<vmem>>, %arg6: memref<512x15xbf16, #tpu.memory_space<vmem>>, %arg7: memref<1x15xf32, #tpu.memory_space<vmem>>, %arg8: memref<2x15xf32, #tpu.memory_space<vmem>>) attributes {dimension_semantics = [], scalar_prefetch = 0 : i64, scratch_operands = 0 : i64, tpu.core_type = #tpu.core_type<tc>} {
    %c0 = arith.constant 0 : index
    %c0_0 = arith.constant 0 : index
    %0 = vector.load %arg1[%c0, %c0_0] : memref<32x128xf32, #tpu.memory_space<vmem>>, vector<32x128xf32>
    %cst = arith.constant 0.000000e+00 : f32
    %1 = vector.broadcast %cst : f32 to vector<2x32xf32>
    %cst_1 = arith.constant 0.000000e+00 : f32
    %2 = vector.broadcast %cst_1 : f32 to vector<2x32xf32>
    %cst_2 = arith.constant 0.000000e+00 : f32
    %3 = vector.broadcast %cst_2 : f32 to vector<2x512xf32>
    %c0_3 = arith.constant 0 : index
    %c0_4 = arith.constant 0 : index
    %c0_5 = arith.constant 0 : index
    %4 = vector.load %arg0[%c0_3, %c0_4, %c0_5] : memref<8x2x128xf32, #tpu.memory_space<vmem>>, vector<1x2x128xf32>
    %5 = vector.shape_cast %4 : vector<1x2x128xf32> to vector<2x128xf32>
    %cst_6 = arith.constant dense<0.000000e+00> : vector<2x128xf32>
    %6 = tpu.matmul %1, %0, %cst_6 {dimension_numbers = #tpu.dot_dimension_numbers<[1], [0], [0], [1], [0, 0, 1, 1], [], []>} : vector<2x32xf32>, vector<32x128xf32>, vector<2x128xf32> -> vector<2x128xf32>
    %7 = arith.addf %5, %6 : vector<2x128xf32>
    %8 = arith.negf %7 : vector<2x128xf32>
    %9 = math.exp %8 : vector<2x128xf32>
    %cst_7 = arith.constant 1.000000e+00 : f32
    %10 = vector.broadcast %cst_7 : f32 to vector<2x128xf32>
    %11 = arith.addf %10, %9 : vector<2x128xf32>
    %12 = arith.divf %10, %11 : vector<2x128xf32>
    %13 = math.tanh %7 : vector<2x128xf32>
    %14 = vector.extract_strided_slice %12 {offsets = [0, 0], sizes = [2, 32], strides = [1, 1]} : vector<2x128xf32> to vector<2x32xf32>
    %15 = vector.extract_strided_slice %12 {offsets = [0, 32], sizes = [2, 32], strides = [1, 1]} : vector<2x128xf32> to vector<2x32xf32>
    %16 = vector.extract_strided_slice %13 {offsets = [0, 64], sizes = [2, 32], strides = [1, 1]} : vector<2x128xf32> to vector<2x32xf32>
    %17 = vector.extract_strided_slice %12 {offsets = [0, 96], sizes = [2, 32], strides = [1, 1]} : vector<2x128xf32> to vector<2x32xf32>
    %18 = arith.mulf %15, %2 : vector<2x32xf32>
    %19 = arith.mulf %14, %16 : vector<2x32xf32>
    %20 = arith.addf %18, %19 : vector<2x32xf32>
    %21 = math.tanh %20 : vector<2x32xf32>
    %22 = arith.mulf %17, %21 : vector<2x32xf32>
    %23 = arith.truncf %22 : vector<2x32xf32> to vector<2x32xbf16>
    %c0_8 = arith.constant 0 : index
    %c0_9 = arith.constant 0 : index
    %c0_10 = arith.constant 0 : index
    %24 = vector.load %arg2[%c0_8, %c0_9, %c0_10] : memref<8x32x512xbf16, #tpu.memory_space<vmem>>, vector<1x32x512xbf16>
    %25 = vector.shape_cast %24 : vector<1x32x512xbf16> to vector<32x512xbf16>
    %cst_11 = arith.constant dense<0.000000e+00> : vector<2x512xf32>
    %26 = tpu.matmul %23, %25, %cst_11 {dimension_numbers = #tpu.dot_dimension_numbers<[1], [0], [0], [1], [0, 0, 1, 1], [], []>} : vector<2x32xbf16>, vector<32x512xbf16>, vector<2x512xf32> -> vector<2x512xf32>
    %27 = arith.addf %3, %26 : vector<2x512xf32>
    %c1 = arith.constant 1 : index
    %c0_12 = arith.constant 0 : index
    %c0_13 = arith.constant 0 : index
    %28 = vector.load %arg0[%c1, %c0_12, %c0_13] : memref<8x2x128xf32, #tpu.memory_space<vmem>>, vector<1x2x128xf32>
    %29 = vector.shape_cast %28 : vector<1x2x128xf32> to vector<2x128xf32>
    %cst_14 = arith.constant dense<0.000000e+00> : vector<2x128xf32>
    %30 = tpu.matmul %22, %0, %cst_14 {dimension_numbers = #tpu.dot_dimension_numbers<[1], [0], [0], [1], [0, 0, 1, 1], [], []>} : vector<2x32xf32>, vector<32x128xf32>, vector<2x128xf32> -> vector<2x128xf32>
    %31 = arith.addf %29, %30 : vector<2x128xf32>
    %32 = arith.negf %31 : vector<2x128xf32>
    %33 = math.exp %32 : vector<2x128xf32>
    %cst_15 = arith.constant 1.000000e+00 : f32
    %34 = vector.broadcast %cst_15 : f32 to vector<2x128xf32>
    %35 = arith.addf %34, %33 : vector<2x128xf32>
    %36 = arith.divf %34, %35 : vector<2x128xf32>
    %37 = math.tanh %31 : vector<2x128xf32>
    %38 = vector.extract_strided_slice %36 {offsets = [0, 0], sizes = [2, 32], strides = [1, 1]} : vector<2x128xf32> to vector<2x32xf32>
    %39 = vector.extract_strided_slice %36 {offsets = [0, 32], sizes = [2, 32], strides = [1, 1]} : vector<2x128xf32> to vector<2x32xf32>
    %40 = vector.extract_strided_slice %37 {offsets = [0, 64], sizes = [2, 32], strides = [1, 1]} : vector<2x128xf32> to vector<2x32xf32>
    %41 = vector.extract_strided_slice %36 {offsets = [0, 96], sizes = [2, 32], strides = [1, 1]} : vector<2x128xf32> to vector<2x32xf32>
    %42 = arith.mulf %39, %20 : vector<2x32xf32>
    %43 = arith.mulf %38, %40 : vector<2x32xf32>
    %44 = arith.addf %42, %43 : vector<2x32xf32>
    %45 = math.tanh %44 : vector<2x32xf32>
    %46 = arith.mulf %41, %45 : vector<2x32xf32>
    %47 = arith.truncf %46 : vector<2x32xf32> to vector<2x32xbf16>
    %c1_16 = arith.constant 1 : index
    %c0_17 = arith.constant 0 : index
    %c0_18 = arith.constant 0 : index
    %48 = vector.load %arg2[%c1_16, %c0_17, %c0_18] : memref<8x32x512xbf16, #tpu.memory_space<vmem>>, vector<1x32x512xbf16>
    %49 = vector.shape_cast %48 : vector<1x32x512xbf16> to vector<32x512xbf16>
    %cst_19 = arith.constant dense<0.000000e+00> : vector<2x512xf32>
    %50 = tpu.matmul %47, %49, %cst_19 {dimension_numbers = #tpu.dot_dimension_numbers<[1], [0], [0], [1], [0, 0, 1, 1], [], []>} : vector<2x32xbf16>, vector<32x512xbf16>, vector<2x512xf32> -> vector<2x512xf32>
    %51 = arith.addf %27, %50 : vector<2x512xf32>
    %c2 = arith.constant 2 : index
    %c0_20 = arith.constant 0 : index
    %c0_21 = arith.constant 0 : index
    %52 = vector.load %arg0[%c2, %c0_20, %c0_21] : memref<8x2x128xf32, #tpu.memory_space<vmem>>, vector<1x2x128xf32>
    %53 = vector.shape_cast %52 : vector<1x2x128xf32> to vector<2x128xf32>
    %cst_22 = arith.constant dense<0.000000e+00> : vector<2x128xf32>
    %54 = tpu.matmul %46, %0, %cst_22 {dimension_numbers = #tpu.dot_dimension_numbers<[1], [0], [0], [1], [0, 0, 1, 1], [], []>} : vector<2x32xf32>, vector<32x128xf32>, vector<2x128xf32> -> vector<2x128xf32>
    %55 = arith.addf %53, %54 : vector<2x128xf32>
    %56 = arith.negf %55 : vector<2x128xf32>
    %57 = math.exp %56 : vector<2x128xf32>
    %cst_23 = arith.constant 1.000000e+00 : f32
    %58 = vector.broadcast %cst_23 : f32 to vector<2x128xf32>
    %59 = arith.addf %58, %57 : vector<2x128xf32>
    %60 = arith.divf %58, %59 : vector<2x128xf32>
    %61 = math.tanh %55 : vector<2x128xf32>
    %62 = vector.extract_strided_slice %60 {offsets = [0, 0], sizes = [2, 32], strides = [1, 1]} : vector<2x128xf32> to vector<2x32xf32>
    %63 = vector.extract_strided_slice %60 {offsets = [0, 32], sizes = [2, 32], strides = [1, 1]} : vector<2x128xf32> to vector<2x32xf32>
    %64 = vector.extract_strided_slice %61 {offsets = [0, 64], sizes = [2, 32], strides = [1, 1]} : vector<2x128xf32> to vector<2x32xf32>
    %65 = vector.extract_strided_slice %60 {offsets = [0, 96], sizes = [2, 32], strides = [1, 1]} : vector<2x128xf32> to vector<2x32xf32>
    %66 = arith.mulf %63, %44 : vector<2x32xf32>
    %67 = arith.mulf %62, %64 : vector<2x32xf32>
    %68 = arith.addf %66, %67 : vector<2x32xf32>
    %69 = math.tanh %68 : vector<2x32xf32>
    %70 = arith.mulf %65, %69 : vector<2x32xf32>
    %71 = arith.truncf %70 : vector<2x32xf32> to vector<2x32xbf16>
    %c2_24 = arith.constant 2 : index
    %c0_25 = arith.constant 0 : index
    %c0_26 = arith.constant 0 : index
    %72 = vector.load %arg2[%c2_24, %c0_25, %c0_26] : memref<8x32x512xbf16, #tpu.memory_space<vmem>>, vector<1x32x512xbf16>
    %73 = vector.shape_cast %72 : vector<1x32x512xbf16> to vector<32x512xbf16>
    %cst_27 = arith.constant dense<0.000000e+00> : vector<2x512xf32>
    %74 = tpu.matmul %71, %73, %cst_27 {dimension_numbers = #tpu.dot_dimension_numbers<[1], [0], [0], [1], [0, 0, 1, 1], [], []>} : vector<2x32xbf16>, vector<32x512xbf16>, vector<2x512xf32> -> vector<2x512xf32>
    %75 = arith.addf %51, %74 : vector<2x512xf32>
    %c3 = arith.constant 3 : index
    %c0_28 = arith.constant 0 : index
    %c0_29 = arith.constant 0 : index
    %76 = vector.load %arg0[%c3, %c0_28, %c0_29] : memref<8x2x128xf32, #tpu.memory_space<vmem>>, vector<1x2x128xf32>
    %77 = vector.shape_cast %76 : vector<1x2x128xf32> to vector<2x128xf32>
    %cst_30 = arith.constant dense<0.000000e+00> : vector<2x128xf32>
    %78 = tpu.matmul %70, %0, %cst_30 {dimension_numbers = #tpu.dot_dimension_numbers<[1], [0], [0], [1], [0, 0, 1, 1], [], []>} : vector<2x32xf32>, vector<32x128xf32>, vector<2x128xf32> -> vector<2x128xf32>
    %79 = arith.addf %77, %78 : vector<2x128xf32>
    %80 = arith.negf %79 : vector<2x128xf32>
    %81 = math.exp %80 : vector<2x128xf32>
    %cst_31 = arith.constant 1.000000e+00 : f32
    %82 = vector.broadcast %cst_31 : f32 to vector<2x128xf32>
    %83 = arith.addf %82, %81 : vector<2x128xf32>
    %84 = arith.divf %82, %83 : vector<2x128xf32>
    %85 = math.tanh %79 : vector<2x128xf32>
    %86 = vector.extract_strided_slice %84 {offsets = [0, 0], sizes = [2, 32], strides = [1, 1]} : vector<2x128xf32> to vector<2x32xf32>
    %87 = vector.extract_strided_slice %84 {offsets = [0, 32], sizes = [2, 32], strides = [1, 1]} : vector<2x128xf32> to vector<2x32xf32>
    %88 = vector.extract_strided_slice %85 {offsets = [0, 64], sizes = [2, 32], strides = [1, 1]} : vector<2x128xf32> to vector<2x32xf32>
    %89 = vector.extract_strided_slice %84 {offsets = [0, 96], sizes = [2, 32], strides = [1, 1]} : vector<2x128xf32> to vector<2x32xf32>
    %90 = arith.mulf %87, %68 : vector<2x32xf32>
    %91 = arith.mulf %86, %88 : vector<2x32xf32>
    %92 = arith.addf %90, %91 : vector<2x32xf32>
    %93 = math.tanh %92 : vector<2x32xf32>
    %94 = arith.mulf %89, %93 : vector<2x32xf32>
    %95 = arith.truncf %94 : vector<2x32xf32> to vector<2x32xbf16>
    %c3_32 = arith.constant 3 : index
    %c0_33 = arith.constant 0 : index
    %c0_34 = arith.constant 0 : index
    %96 = vector.load %arg2[%c3_32, %c0_33, %c0_34] : memref<8x32x512xbf16, #tpu.memory_space<vmem>>, vector<1x32x512xbf16>
    %97 = vector.shape_cast %96 : vector<1x32x512xbf16> to vector<32x512xbf16>
    %cst_35 = arith.constant dense<0.000000e+00> : vector<2x512xf32>
    %98 = tpu.matmul %95, %97, %cst_35 {dimension_numbers = #tpu.dot_dimension_numbers<[1], [0], [0], [1], [0, 0, 1, 1], [], []>} : vector<2x32xbf16>, vector<32x512xbf16>, vector<2x512xf32> -> vector<2x512xf32>
    %99 = arith.addf %75, %98 : vector<2x512xf32>
    %c4 = arith.constant 4 : index
    %c0_36 = arith.constant 0 : index
    %c0_37 = arith.constant 0 : index
    %100 = vector.load %arg0[%c4, %c0_36, %c0_37] : memref<8x2x128xf32, #tpu.memory_space<vmem>>, vector<1x2x128xf32>
    %101 = vector.shape_cast %100 : vector<1x2x128xf32> to vector<2x128xf32>
    %cst_38 = arith.constant dense<0.000000e+00> : vector<2x128xf32>
    %102 = tpu.matmul %94, %0, %cst_38 {dimension_numbers = #tpu.dot_dimension_numbers<[1], [0], [0], [1], [0, 0, 1, 1], [], []>} : vector<2x32xf32>, vector<32x128xf32>, vector<2x128xf32> -> vector<2x128xf32>
    %103 = arith.addf %101, %102 : vector<2x128xf32>
    %104 = arith.negf %103 : vector<2x128xf32>
    %105 = math.exp %104 : vector<2x128xf32>
    %cst_39 = arith.constant 1.000000e+00 : f32
    %106 = vector.broadcast %cst_39 : f32 to vector<2x128xf32>
    %107 = arith.addf %106, %105 : vector<2x128xf32>
    %108 = arith.divf %106, %107 : vector<2x128xf32>
    %109 = math.tanh %103 : vector<2x128xf32>
    %110 = vector.extract_strided_slice %108 {offsets = [0, 0], sizes = [2, 32], strides = [1, 1]} : vector<2x128xf32> to vector<2x32xf32>
    %111 = vector.extract_strided_slice %108 {offsets = [0, 32], sizes = [2, 32], strides = [1, 1]} : vector<2x128xf32> to vector<2x32xf32>
    %112 = vector.extract_strided_slice %109 {offsets = [0, 64], sizes = [2, 32], strides = [1, 1]} : vector<2x128xf32> to vector<2x32xf32>
    %113 = vector.extract_strided_slice %108 {offsets = [0, 96], sizes = [2, 32], strides = [1, 1]} : vector<2x128xf32> to vector<2x32xf32>
    %114 = arith.mulf %111, %92 : vector<2x32xf32>
    %115 = arith.mulf %110, %112 : vector<2x32xf32>
    %116 = arith.addf %114, %115 : vector<2x32xf32>
    %117 = math.tanh %116 : vector<2x32xf32>
    %118 = arith.mulf %113, %117 : vector<2x32xf32>
    %119 = arith.truncf %118 : vector<2x32xf32> to vector<2x32xbf16>
    %c4_40 = arith.constant 4 : index
    %c0_41 = arith.constant 0 : index
    %c0_42 = arith.constant 0 : index
    %120 = vector.load %arg2[%c4_40, %c0_41, %c0_42] : memref<8x32x512xbf16, #tpu.memory_space<vmem>>, vector<1x32x512xbf16>
    %121 = vector.shape_cast %120 : vector<1x32x512xbf16> to vector<32x512xbf16>
    %cst_43 = arith.constant dense<0.000000e+00> : vector<2x512xf32>
    %122 = tpu.matmul %119, %121, %cst_43 {dimension_numbers = #tpu.dot_dimension_numbers<[1], [0], [0], [1], [0, 0, 1, 1], [], []>} : vector<2x32xbf16>, vector<32x512xbf16>, vector<2x512xf32> -> vector<2x512xf32>
    %123 = arith.addf %99, %122 : vector<2x512xf32>
    %c5 = arith.constant 5 : index
    %c0_44 = arith.constant 0 : index
    %c0_45 = arith.constant 0 : index
    %124 = vector.load %arg0[%c5, %c0_44, %c0_45] : memref<8x2x128xf32, #tpu.memory_space<vmem>>, vector<1x2x128xf32>
    %125 = vector.shape_cast %124 : vector<1x2x128xf32> to vector<2x128xf32>
    %cst_46 = arith.constant dense<0.000000e+00> : vector<2x128xf32>
    %126 = tpu.matmul %118, %0, %cst_46 {dimension_numbers = #tpu.dot_dimension_numbers<[1], [0], [0], [1], [0, 0, 1, 1], [], []>} : vector<2x32xf32>, vector<32x128xf32>, vector<2x128xf32> -> vector<2x128xf32>
    %127 = arith.addf %125, %126 : vector<2x128xf32>
    %128 = arith.negf %127 : vector<2x128xf32>
    %129 = math.exp %128 : vector<2x128xf32>
    %cst_47 = arith.constant 1.000000e+00 : f32
    %130 = vector.broadcast %cst_47 : f32 to vector<2x128xf32>
    %131 = arith.addf %130, %129 : vector<2x128xf32>
    %132 = arith.divf %130, %131 : vector<2x128xf32>
    %133 = math.tanh %127 : vector<2x128xf32>
    %134 = vector.extract_strided_slice %132 {offsets = [0, 0], sizes = [2, 32], strides = [1, 1]} : vector<2x128xf32> to vector<2x32xf32>
    %135 = vector.extract_strided_slice %132 {offsets = [0, 32], sizes = [2, 32], strides = [1, 1]} : vector<2x128xf32> to vector<2x32xf32>
    %136 = vector.extract_strided_slice %133 {offsets = [0, 64], sizes = [2, 32], strides = [1, 1]} : vector<2x128xf32> to vector<2x32xf32>
    %137 = vector.extract_strided_slice %132 {offsets = [0, 96], sizes = [2, 32], strides = [1, 1]} : vector<2x128xf32> to vector<2x32xf32>
    %138 = arith.mulf %135, %116 : vector<2x32xf32>
    %139 = arith.mulf %134, %136 : vector<2x32xf32>
    %140 = arith.addf %138, %139 : vector<2x32xf32>
    %141 = math.tanh %140 : vector<2x32xf32>
    %142 = arith.mulf %137, %141 : vector<2x32xf32>
    %143 = arith.truncf %142 : vector<2x32xf32> to vector<2x32xbf16>
    %c5_48 = arith.constant 5 : index
    %c0_49 = arith.constant 0 : index
    %c0_50 = arith.constant 0 : index
    %144 = vector.load %arg2[%c5_48, %c0_49, %c0_50] : memref<8x32x512xbf16, #tpu.memory_space<vmem>>, vector<1x32x512xbf16>
    %145 = vector.shape_cast %144 : vector<1x32x512xbf16> to vector<32x512xbf16>
    %cst_51 = arith.constant dense<0.000000e+00> : vector<2x512xf32>
    %146 = tpu.matmul %143, %145, %cst_51 {dimension_numbers = #tpu.dot_dimension_numbers<[1], [0], [0], [1], [0, 0, 1, 1], [], []>} : vector<2x32xbf16>, vector<32x512xbf16>, vector<2x512xf32> -> vector<2x512xf32>
    %147 = arith.addf %123, %146 : vector<2x512xf32>
    %c6 = arith.constant 6 : index
    %c0_52 = arith.constant 0 : index
    %c0_53 = arith.constant 0 : index
    %148 = vector.load %arg0[%c6, %c0_52, %c0_53] : memref<8x2x128xf32, #tpu.memory_space<vmem>>, vector<1x2x128xf32>
    %149 = vector.shape_cast %148 : vector<1x2x128xf32> to vector<2x128xf32>
    %cst_54 = arith.constant dense<0.000000e+00> : vector<2x128xf32>
    %150 = tpu.matmul %142, %0, %cst_54 {dimension_numbers = #tpu.dot_dimension_numbers<[1], [0], [0], [1], [0, 0, 1, 1], [], []>} : vector<2x32xf32>, vector<32x128xf32>, vector<2x128xf32> -> vector<2x128xf32>
    %151 = arith.addf %149, %150 : vector<2x128xf32>
    %152 = arith.negf %151 : vector<2x128xf32>
    %153 = math.exp %152 : vector<2x128xf32>
    %cst_55 = arith.constant 1.000000e+00 : f32
    %154 = vector.broadcast %cst_55 : f32 to vector<2x128xf32>
    %155 = arith.addf %154, %153 : vector<2x128xf32>
    %156 = arith.divf %154, %155 : vector<2x128xf32>
    %157 = math.tanh %151 : vector<2x128xf32>
    %158 = vector.extract_strided_slice %156 {offsets = [0, 0], sizes = [2, 32], strides = [1, 1]} : vector<2x128xf32> to vector<2x32xf32>
    %159 = vector.extract_strided_slice %156 {offsets = [0, 32], sizes = [2, 32], strides = [1, 1]} : vector<2x128xf32> to vector<2x32xf32>
    %160 = vector.extract_strided_slice %157 {offsets = [0, 64], sizes = [2, 32], strides = [1, 1]} : vector<2x128xf32> to vector<2x32xf32>
    %161 = vector.extract_strided_slice %156 {offsets = [0, 96], sizes = [2, 32], strides = [1, 1]} : vector<2x128xf32> to vector<2x32xf32>
    %162 = arith.mulf %159, %140 : vector<2x32xf32>
    %163 = arith.mulf %158, %160 : vector<2x32xf32>
    %164 = arith.addf %162, %163 : vector<2x32xf32>
    %165 = math.tanh %164 : vector<2x32xf32>
    %166 = arith.mulf %161, %165 : vector<2x32xf32>
    %167 = arith.truncf %166 : vector<2x32xf32> to vector<2x32xbf16>
    %c6_56 = arith.constant 6 : index
    %c0_57 = arith.constant 0 : index
    %c0_58 = arith.constant 0 : index
    %168 = vector.load %arg2[%c6_56, %c0_57, %c0_58] : memref<8x32x512xbf16, #tpu.memory_space<vmem>>, vector<1x32x512xbf16>
    %169 = vector.shape_cast %168 : vector<1x32x512xbf16> to vector<32x512xbf16>
    %cst_59 = arith.constant dense<0.000000e+00> : vector<2x512xf32>
    %170 = tpu.matmul %167, %169, %cst_59 {dimension_numbers = #tpu.dot_dimension_numbers<[1], [0], [0], [1], [0, 0, 1, 1], [], []>} : vector<2x32xbf16>, vector<32x512xbf16>, vector<2x512xf32> -> vector<2x512xf32>
    %171 = arith.addf %147, %170 : vector<2x512xf32>
    %c7 = arith.constant 7 : index
    %c0_60 = arith.constant 0 : index
    %c0_61 = arith.constant 0 : index
    %172 = vector.load %arg0[%c7, %c0_60, %c0_61] : memref<8x2x128xf32, #tpu.memory_space<vmem>>, vector<1x2x128xf32>
    %173 = vector.shape_cast %172 : vector<1x2x128xf32> to vector<2x128xf32>
    %cst_62 = arith.constant dense<0.000000e+00> : vector<2x128xf32>
    %174 = tpu.matmul %166, %0, %cst_62 {dimension_numbers = #tpu.dot_dimension_numbers<[1], [0], [0], [1], [0, 0, 1, 1], [], []>} : vector<2x32xf32>, vector<32x128xf32>, vector<2x128xf32> -> vector<2x128xf32>
    %175 = arith.addf %173, %174 : vector<2x128xf32>
    %176 = arith.negf %175 : vector<2x128xf32>
    %177 = math.exp %176 : vector<2x128xf32>
    %cst_63 = arith.constant 1.000000e+00 : f32
    %178 = vector.broadcast %cst_63 : f32 to vector<2x128xf32>
    %179 = arith.addf %178, %177 : vector<2x128xf32>
    %180 = arith.divf %178, %179 : vector<2x128xf32>
    %181 = math.tanh %175 : vector<2x128xf32>
    %182 = vector.extract_strided_slice %180 {offsets = [0, 0], sizes = [2, 32], strides = [1, 1]} : vector<2x128xf32> to vector<2x32xf32>
    %183 = vector.extract_strided_slice %180 {offsets = [0, 32], sizes = [2, 32], strides = [1, 1]} : vector<2x128xf32> to vector<2x32xf32>
    %184 = vector.extract_strided_slice %181 {offsets = [0, 64], sizes = [2, 32], strides = [1, 1]} : vector<2x128xf32> to vector<2x32xf32>
    %185 = vector.extract_strided_slice %180 {offsets = [0, 96], sizes = [2, 32], strides = [1, 1]} : vector<2x128xf32> to vector<2x32xf32>
    %186 = arith.mulf %183, %164 : vector<2x32xf32>
    %187 = arith.mulf %182, %184 : vector<2x32xf32>
    %188 = arith.addf %186, %187 : vector<2x32xf32>
    %189 = math.tanh %188 : vector<2x32xf32>
    %190 = arith.mulf %185, %189 : vector<2x32xf32>
    %191 = arith.truncf %190 : vector<2x32xf32> to vector<2x32xbf16>
    %c7_64 = arith.constant 7 : index
    %c0_65 = arith.constant 0 : index
    %c0_66 = arith.constant 0 : index
    %192 = vector.load %arg2[%c7_64, %c0_65, %c0_66] : memref<8x32x512xbf16, #tpu.memory_space<vmem>>, vector<1x32x512xbf16>
    %193 = vector.shape_cast %192 : vector<1x32x512xbf16> to vector<32x512xbf16>
    %cst_67 = arith.constant dense<0.000000e+00> : vector<2x512xf32>
    %194 = tpu.matmul %191, %193, %cst_67 {dimension_numbers = #tpu.dot_dimension_numbers<[1], [0], [0], [1], [0, 0, 1, 1], [], []>} : vector<2x32xbf16>, vector<32x512xbf16>, vector<2x512xf32> -> vector<2x512xf32>
    %195 = arith.addf %171, %194 : vector<2x512xf32>
    %c0_68 = arith.constant 0 : index
    %c0_69 = arith.constant 0 : index
    %196 = vector.load %arg3[%c0_68, %c0_69] : memref<1x512xf32, #tpu.memory_space<vmem>>, vector<1x512xf32>
    %197 = vector.broadcast %196 : vector<1x512xf32> to vector<2x512xf32>
    %198 = arith.addf %195, %197 : vector<2x512xf32>
    %cst_70 = arith.constant 0.000000e+00 : f32
    %199 = vector.broadcast %cst_70 : f32 to vector<2x512xf32>
    %200 = arith.maximumf %198, %199 : vector<2x512xf32>
    %201 = arith.truncf %200 : vector<2x512xf32> to vector<2x512xbf16>
    %c0_71 = arith.constant 0 : index
    %c0_72 = arith.constant 0 : index
    %202 = vector.load %arg4[%c0_71, %c0_72] : memref<512x512xbf16, #tpu.memory_space<vmem>>, vector<512x512xbf16>
    %cst_73 = arith.constant dense<0.000000e+00> : vector<2x512xf32>
    %203 = tpu.matmul %201, %202, %cst_73 {dimension_numbers = #tpu.dot_dimension_numbers<[1], [0], [0], [1], [0, 0, 1, 1], [], []>} : vector<2x512xbf16>, vector<512x512xbf16>, vector<2x512xf32> -> vector<2x512xf32>
    %c0_74 = arith.constant 0 : index
    %c0_75 = arith.constant 0 : index
    %204 = vector.load %arg5[%c0_74, %c0_75] : memref<1x512xf32, #tpu.memory_space<vmem>>, vector<1x512xf32>
    %205 = vector.broadcast %204 : vector<1x512xf32> to vector<2x512xf32>
    %206 = arith.addf %203, %205 : vector<2x512xf32>
    %cst_76 = arith.constant 0.000000e+00 : f32
    %207 = vector.broadcast %cst_76 : f32 to vector<2x512xf32>
    %208 = arith.maximumf %206, %207 : vector<2x512xf32>
    %209 = arith.truncf %208 : vector<2x512xf32> to vector<2x512xbf16>
    %c0_77 = arith.constant 0 : index
    %c0_78 = arith.constant 0 : index
    %210 = vector.load %arg6[%c0_77, %c0_78] : memref<512x15xbf16, #tpu.memory_space<vmem>>, vector<512x15xbf16>
    %cst_79 = arith.constant dense<0.000000e+00> : vector<2x15xf32>
    %211 = tpu.matmul %209, %210, %cst_79 {dimension_numbers = #tpu.dot_dimension_numbers<[1], [0], [0], [1], [0, 0, 1, 1], [], []>} : vector<2x512xbf16>, vector<512x15xbf16>, vector<2x15xf32> -> vector<2x15xf32>
    %c0_80 = arith.constant 0 : index
    %c0_81 = arith.constant 0 : index
    %212 = vector.load %arg7[%c0_80, %c0_81] : memref<1x15xf32, #tpu.memory_space<vmem>>, vector<1x15xf32>
    %213 = vector.broadcast %212 : vector<1x15xf32> to vector<2x15xf32>
    %214 = arith.addf %211, %213 : vector<2x15xf32>
    %c0_82 = arith.constant 0 : index
    %c0_83 = arith.constant 0 : index
    %215 = vector.load %arg8[%c0_82, %c0_83] : memref<2x15xf32, #tpu.memory_space<vmem>>, vector<2x15xf32>
    tpu.vector_store %arg8[%c0_82, %c0_83], %214 {strides = array<i32>} : memref<2x15xf32, #tpu.memory_space<vmem>>, vector<2x15xf32>,
    return
  }
}

</mosaic_0001>

<bundles_post_ra>
// kernel: bilstm_model_forward.1
= control target key start
LH: loop header
LB: loop body
LE: loop exit
PB: predicated region body
PF: predicated region fallthrough
CT: control target
= control target key end

     0   :  { %13 = vsyncpa [#allocation3], 0  ;;  %s5051_s0 = inlined_call_operand.vmem [shape: f32[8,2,128], index: 0, kind: input, shape index: {}]   ;;  %s5052_s1 = inlined_call_operand.vmem [shape: f32[32,128], index: 1, kind: input, shape index: {}]   ;;  %s5053_s2 = inlined_call_operand.vmem [shape: bf16[8,32,512], index: 2, kind: input, shape index: {}]   ;;  %s5054_s3 = inlined_call_operand.vmem [shape: f32[1,512], index: 3, kind: input, shape index: {}]   ;;  %s5055_s4 = inlined_call_operand.hbm [shape: bf16[512,512], index: 4, kind: input, shape index: {}]   ;;  %s5056_s5 = inlined_call_operand.hbm [shape: f32[1,512], index: 5, kind: input, shape index: {}]   ;;  %s5057_s6 = inlined_call_operand.vmem [shape: bf16[512,15], index: 6, kind: input, shape index: {}]   ;;  %s5058_s7 = inlined_call_operand.vmem [shape: f32[1,15], index: 7, kind: input, shape index: {}]   ;;  %s5059_s8 = inlined_call_operand.hbm [shape: f32[2,15], index: 8, kind: output, shape index: {}]  }
   0x1   :  { %14 = vsyncpa [#allocation6], 0 }
   0x2   :  { %15 = vsyncpa [#allocation4], 0  ;;  %s4377_s27 = smov [#allocation2]   ;;  %s4305_s9 = scalar_lea.hbm %s5055_s4, 16384 }
   0x3   :  { %s29_s28 = sshll.u32 %s4377_s27, 4  ;;  %p4306_p0 = scmp.ne.s32.totalorder %s5055_s4, %s4305_s9  ;;  %s30_s28 = int_to_ptr.vmem [resolvable:$true] %s29_s28 }
   0x4   :  { %p4309_p1 = scmp.lt.u32.totalorder %s4305_s9, %s5055_s4 }
   0x6   :  { %p4311_p2 = pnand %p4309_p1, %p4306_p0 }
   0x8   :  { %4314 = shalt.err (!%p4311_p2)
}
   0x9   :  { %s4315_s14 = scalar_lea.vmem %s30_s28, 16384  ;;  %p4320_p4 = scmp.lt.s32.totalorder %s30_s28, %s30_s28 }
   0xa   :  { %p4316_p3 = scmp.ne.s32.totalorder %s30_s28, %s4315_s14  ;;  %p4321_p5 = scmp.lt.s32.totalorder %s4315_s14, %s4315_s14 }
   0xc   :  { %p4322_p6 = por %p4321_p5, %p4320_p4 }
   0xe   :  { %p4323_p7 = pnand %p4322_p6, %p4316_p3 }
  0x10   :  { %4326 = shalt.err (!%p4323_p7)
}
  0x11   :  { %s4378_s15 = smov 256   ;;  %s4379_s16 = smov 16  }
  0x12   :  { %35 = dma.hbm_to_vmem [thread:$0]  %s5055_s4, 16384, %s30_s28, [#allocation3], %s4378_s15, %s4378_s15, %s4379_s16  }
  0x13   :  { %s4380_s19 = smov [#allocation5]   ;;  %s4327_s23 = scalar_lea.hbm %s5056_s5, 64 }
  0x14   :  { %s42_s20 = sshll.u32 %s4380_s19, 4  ;;  %p4328_p8 = scmp.ne.s32.totalorder %s5056_s5, %s4327_s23  ;;  %s43_s20 = int_to_ptr.vmem [resolvable:$true] %s42_s20 }
  0x15   :  { %p4331_p9 = scmp.lt.u32.totalorder %s4327_s23, %s5056_s5 }
  0x17   :  { %p4333_p10 = pnand %p4331_p9, %p4328_p8 }
  0x19   :  { %4336 = shalt.err (!%p4333_p10)
}
  0x1a   :  { %s4337_s29 = scalar_lea.vmem %s43_s20, 64  ;;  %p4342_p12 = scmp.lt.s32.totalorder %s43_s20, %s43_s20 }
  0x1b   :  { %p4338_p11 = scmp.ne.s32.totalorder %s43_s20, %s4337_s29  ;;  %p4343_p13 = scmp.lt.s32.totalorder %s4337_s29, %s4337_s29 }
  0x1d   :  { %p4344_p0 = por %p4343_p13, %p4342_p12 }
  0x1f   :  { %p4345_p1 = pnand %p4344_p0, %p4338_p11 }
  0x21   :  { %4348 = shalt.err (!%p4345_p1)
}
  0x22   :  { %45 = dma.hbm_to_vmem [thread:$0]  %s5056_s5, 64, %s43_s20, [#allocation6]  }
  0x23   :  { %4371 = dma.done.wait [#allocation3], 16384  }
  0x24   :  { %4372 = vsyncadd [#allocation3], 4294950912 }
  0x25   :  { %4373 = dma.done.wait [#allocation6], 64  }
  0x26   :  { %4374 = vsyncadd [#allocation6], 4294967232  ;;  %v4381_v0 = vmov 0.0|0.0   ;;  %vm4382_vm0 = vmmov 0   ;;  %v4383_v1 = vmov 0.0   ;;  %v57_v2 = vld [vmem:[%s5052_s1] sm:$0xff] }
  0x27   :  { %3850 = vmatprep.subr.bf16.mxu0 %v4381_v0  ;;  %3770 = vmatprep.mubr.msk.f32.mxu0 %vm4382_vm0, %v4383_v1  ;;  %v58_v3 = vld [vmem:[%s5052_s1 + $0x8] sm:$0xff]  ;;  %v59_v4 = vld [vmem:[%s5052_s1 + $0x10] sm:$0xff]  ;;  %v60_v6 = vld [vmem:[%s5052_s1 + $0x18] sm:$0xff]  ;;  %s4384_s1 = smov 64   ;;  %s4385_s17 = smov 32   ;;  %vm62_vm1 = vcmask 261120  }
  0x28   :  { %3856 = vmatprep.subr.bf16.mxu1 %v4381_v0  ;;  %3781 = vmatprep.mubr.msk.f32.mxu1 %vm4382_vm0, %v4383_v1  ;;  %v4472_v5 = vpack.c.bf16 %v58_v3, %v57_v2  ;;  %v4478_v7 = vpack.c.bf16 %v60_v6, %v59_v4  ;;  %v61_v8 = vld [vmem:[%s5051_s0] sm:$0x3]  ;;  %v3360_v26 = vld [vmem:[%s5051_s0 + $0x2] sm:$0x3]  ;;  %v3923_v41 = vld [vmem:[%s5053_s2 + $0x44] ss:$16 sps:$4 sm:$0xff]  }
  0x29   :  { %v3921_v40 = vld [vmem:[%s5053_s2 + $0x40] ss:$16 sps:$4 sm:$0xff]   ;;  %v3924_v42 = vld [vmem:[%s5053_s2 + $0x48] ss:$16 sps:$4 sm:$0xff]   ;;  %v3926_v43 = vld [vmem:[%s5053_s2 + $0x4c] ss:$16 sps:$4 sm:$0xff]  }
  0x2a   :  { %3852 = vmatpush3.bf16.msra.mxu0 %v4472_v5  ;;  %3858 = vmatpush3.bf16.msra.mxu1 %v4472_v5  ;;  %v3929_v44 = vld [vmem:[%s5053_s2 + $0x64] ss:$16 sps:$4 sm:$0xff]   ;;  %v3932_v45 = vld [vmem:[%s5053_s2 + $0x6c] ss:$16 sps:$4 sm:$0xff]   ;;  %v3927_v46 = vld [vmem:[%s5053_s2 + $0x60] ss:$16 sps:$4 sm:$0xff]  }
  0x2b   :  { %3853 = vmatprep.subr.bf16.mxu0 %v4381_v0  ;;  %3859 = vmatprep.subr.bf16.mxu1 %v4381_v0  ;;  %v3930_v48 = vld [vmem:[%s5053_s2 + $0x68] ss:$16 sps:$4 sm:$0xff]   ;;  %v3935_v49 = vld [vmem:[%s5053_s2 + $0x4] ss:$16 sps:$4 sm:$0xff]   ;;  %v4386_v50 = vmov 0   ;;  %s4387_s29 = smov [#allocation7]  }
  0x2c   :  { %v3938_v52 = vld [vmem:[%s5053_s2 + $0xc] ss:$16 sps:$4 sm:$0xff]   ;;  %v3933_v56 = vld [vmem:[%s5053_s2] ss:$16 sps:$4 sm:$0xff]   ;;  %v3936_v57 = vld [vmem:[%s5053_s2 + $0x8] ss:$16 sps:$4 sm:$0xff]  }
  0x2d   :  { %v3941_v58 = vld [vmem:[%s5053_s2 + $0x24] ss:$16 sps:$4 sm:$0xff]   ;;  %v3944_v59 = vld [vmem:[%s5053_s2 + $0x2c] ss:$16 sps:$4 sm:$0xff]   ;;  %v3939_v61 = vld [vmem:[%s5053_s2 + $0x20] ss:$16 sps:$4 sm:$0xff]  }
  0x2e   :  { %3855 = vmatpush3.bf16.msra.mxu0 %v4478_v7  ;;  %3861 = vmatpush3.bf16.msra.mxu1 %v4478_v7  ;;  %v3942_v62 = vld [vmem:[%s5053_s2 + $0x28] ss:$16 sps:$4 sm:$0xff]   ;;  %vm3341_vm2 = vcmask 115712  }
  0x2f   :  { %328 = vmatprep.subr.bf16.mxu0 %v3923_v41  ;;  %369 = vmatprep.subr.bf16.mxu1 %v3926_v43  ;;  %v3947_v41 = vld [vmem:[%s5053_s2 + $0x84] ss:$16 sps:$4 sm:$0xff]  }
  0x30   :  { %v3953_v43 = vld [vmem:[%s5053_s2 + $0xa4] ss:$16 sps:$4 sm:$0xff]  }
  0x31   :  { %3771 = vmatmul.mubr.f32.vlgmr.msra.gmra.mrb[0].mxu0 %v4383_v1 }
  0x32   :  { %329 = vmatpush1.bf16.msra.mxu0 %v3921_v40  ;;  %360 = vmatprep.mubr.bf16.mxu0 %v4386_v50  ;;  %v3945_v40 = vld [vmem:[%s5053_s2 + $0x80] ss:$16 sps:$4 sm:$0xff]  }
  0x33   :  { %330 = vmatprep.subr.bf16.mxu0 %v3929_v44  ;;  %v3956_v44 = vld [vmem:[%s5053_s2 + $0xac] ss:$16 sps:$4 sm:$0xff]  }
  0x36   :  { %331 = vmatpush1.bf16.msra.mxu0 %v3927_v46  ;;  %v3954_v46 = vld [vmem:[%s5053_s2 + $0xa8] ss:$16 sps:$4 sm:$0xff]  }
  0x37   :  { %456 = vmatprep.subr.bf16.mxu0 %v3935_v49 }
 0x104   :  { %v132_v9 = vpop.f32.mrb[0].mxu0 }
 0x105   :  { %v136_v10 = vadd.f32 %v132_v9, %v61_v8  ;;  %v3772_v11 = vpop.f32.mrb[1].mxu0 }
 0x107   :  { %4241 = vtanh.f32 %v136_v10  ;;  %v3359_v13 = vmul.f32 -1.442695, %v136_v10 }
 0x109   :  { %4243 = vpow2.f32 %v3359_v13 }
 0x111   :  { %v4242_v12 = vpop.eup %4241 }
 0x112   :  { %146 = vrot.lane.b32.xlu0 %v4242_v12, %s4384_s1 }
 0x113   :  { %v4244_v14 = vpop.eup %4243 }
 0x114   :  { %v140_v15 = vadd.f32 1.0, %v4244_v14 }
 0x116   :  { %4245 = vrcp.f32 %v140_v15 }
 0x120   :  { %v4246_v16 = vpop.eup %4245 }
 0x121   :  { %v144_v19 = vmul.f32 0.0, %v4246_v16 }
 0x184   :  { %v147_v17 = vpop.permute.xlu0 %146 }
 0x185   :  { %v149_v18 = vmul.f32 %v4246_v16, %v147_v17 }
 0x187   :  { %151 = vrot.lane.b32.xlu0 %v149_v18, %s4385_s17 }
 0x1f9   :  { %v152_v20 = vpop.permute.xlu0 %151 }
 0x1fa   :  { %v154_v21 = vadd.f32 %v152_v20, %v144_v19 }
 0x1fc   :  { %4247 = vtanh.f32 %v154_v21 }
 0x206   :  { %v4248_v22 = vpop.eup %4247 }
 0x207   :  { %157 = vrot.lane.b32.xlu1 %v4248_v22, %s4384_s1 }
 0x279   :  { %v158_v23 = vpop.permute.xlu1 %157 }
 0x27a   :  { %v160_v24 = vmul.f32 %v4246_v16, %v158_v23 }
 0x27c   :  { %173 = vrot.lane.b32.xlu1 %v160_v24, %s4385_s17  ;;  %v161_v51 = vpack.c.bf16 %v160_v24, %v160_v24 }
 0x2ee   :  { %v174_v25 = vpop.permute.xlu1 %173 }
 0x2ef   :  { %3782 = vmatmul.mubr.msk.f32.vlgmr.msra.gmra.mrb[0].mxu1 %vm62_vm1, %v174_v25  ;;  %v3391_v25 = vld [vmem:[%s5051_s0 + $0x4] sm:$0x3] }
 0x2f0   :  { %370 = vmatpush1.bf16.msra.mxu1 %v3924_v42  ;;  %401 = vmatprep.mubr.bf16.mxu1 %v4386_v50  ;;  %v3948_v42 = vld [vmem:[%s5053_s2 + $0x88] ss:$16 sps:$4 sm:$0xff]  }
 0x2f1   :  { %371 = vmatprep.subr.bf16.mxu1 %v3932_v45  ;;  %v3951_v45 = vld [vmem:[%s5053_s2 + $0xa0] ss:$16 sps:$4 sm:$0xff]  }
 0x2f4   :  { %372 = vmatpush1.bf16.msra.mxu1 %v3930_v48 }
 0x2f5   :  { %497 = vmatprep.subr.bf16.mxu1 %v3938_v52 }
 0x3c2   :  { %v243_v27 = vpop.f32.mrb[0].mxu1 }
 0x3c3   :  { %v247_v28 = vadd.f32 %v3360_v26, %v243_v27  ;;  %v3783_v29 = vpop.f32.mrb[1].mxu1 }
 0x3c5   :  { %4249 = vtanh.f32 %v247_v28  ;;  %v3362_v31 = vmul.f32 -1.442695, %v247_v28 }
 0x3c7   :  { %4251 = vpow2.f32 %v3362_v31 }
 0x3cf   :  { %v4250_v30 = vpop.eup %4249 }
 0x3d0   :  { %257 = vrot.lane.b32.xlu0 %v4250_v30, %s4384_s1 }
 0x3d1   :  { %v4252_v32 = vpop.eup %4251 }
 0x3d2   :  { %v251_v33 = vadd.f32 1.0, %v4252_v32 }
 0x3d4   :  { %4253 = vrcp.f32 %v251_v33 }
 0x3de   :  { %v4254_v34 = vpop.eup %4253 }
 0x3df   :  { %v255_v37 = vmul.f32 %v4254_v34, %v154_v21 }
 0x442   :  { %v258_v35 = vpop.permute.xlu0 %257 }
 0x443   :  { %v260_v36 = vmul.f32 %v4254_v34, %v258_v35 }
 0x445   :  { %262 = vrot.lane.b32.xlu1 %v260_v36, %s4385_s17 }
 0x4b7   :  { %v263_v38 = vpop.permute.xlu1 %262 }
 0x4b8   :  { %v4499_v39 = vadd.f32 %v263_v38, %v255_v37 }
 0x4ba   :  { %4255 = vtanh.f32 %v4499_v39 }
 0x4c4   :  { %v4256_v47 = vpop.eup %4255 }
 0x4c5   :  { %268 = vrot.lane.b32.xlu0 %v4256_v47, %s4384_s1 }
 0x4c9   :  { %411 = vrot.lane.b32.xlu0 %v161_v51, %s4385_s17 }
 0x537   :  { %v269_v53 = vpop.permute.xlu0 %268 }
 0x538   :  { %v271_v54 = vmul.f32 %v4254_v34, %v269_v53 }
 0x53a   :  { %v272_v55 = vpack.c.bf16 %v271_v54, %v271_v54 }
 0x53b   :  { %v412_v63 = vpop.permute.xlu0 %411 }
 0x53c   :  { %283 = vrot.lane.b32.xlu1 %v272_v55, %s4385_s17 }
 0x540   :  { %541 = vrot.lane.b32.xlu1 %v271_v54, %s4385_s17 }
 0x5ae   :  { %v284_v60 = vpop.permute.xlu1 %283 }
 0x5af   :  { %3379 = vmatmul.mubr.msk.bf16.vlgmr.msra.gmra.mrb[4].mxu0 %vm62_vm1, %v284_v60  ;;  %3380 = vmatmul.mubr.msk.bf16.vlgmr.msra.gmra.mrb[4].mxu1 %vm62_vm1, %v284_v60 }
 0x5b0   :  { %457 = vmatpush1.bf16.msra.mxu0 %v3933_v56  ;;  %498 = vmatpush1.bf16.msra.mxu1 %v3936_v57 }
 0x5b1   :  { %458 = vmatprep.subr.bf16.mxu0 %v3941_v58  ;;  %499 = vmatprep.subr.bf16.mxu1 %v3944_v59 }
 0x5b2   :  { %488 = vmatprep.mubr.bf16.mxu0 %v4386_v50  ;;  %529 = vmatprep.mubr.bf16.mxu1 %v4386_v50  ;;  %v542_v2 = vpop.permute.xlu1 %541 }
 0x5b4   :  { %459 = vmatpush1.bf16.msra.mxu0 %v3939_v61  ;;  %500 = vmatpush1.bf16.msra.mxu1 %v3942_v62 }
 0x5b5   :  { %3862 = vmatprep.subr.bf16.mxu0 %v4381_v0  ;;  %696 = vmatprep.subr.bf16.mxu1 %v3947_v41 }
 0x5b7   :  { %3389 = vmatmul.mubr.msk.bf16.vlgmr.msra.gmra.mrb[8].mxu0 %vm62_vm1, %v412_v63  ;;  %3390 = vmatmul.mubr.msk.bf16.vlgmr.msra.gmra.mrb[8].mxu1 %vm62_vm1, %v412_v63 }
 0x5b8   :  { %3864 = vmatpush3.bf16.msra.mxu0 %v4472_v5  ;;  %3792 = vmatprep.mubr.msk.f32.mxu0 %vm4382_vm0, %v4383_v1 }
 0x5b9   :  { %3865 = vmatprep.subr.bf16.mxu0 %v4381_v0  ;;  %728 = vmatprep.mubr.bf16.mxu1 %v4386_v50 }
 0x5ba   :  { %697 = vmatpush1.bf16.msra.mxu1 %v3945_v40 }
 0x5bb   :  { %698 = vmatprep.subr.bf16.mxu1 %v3953_v43 }
 0x5bc   :  { %3867 = vmatpush3.bf16.msra.mxu0 %v4478_v7 }
 0x5be   :  { %699 = vmatpush1.bf16.msra.mxu1 %v3951_v45 }
 0x5bf   :  { %3793 = vmatmul.mubr.msk.f32.vlgmr.msra.gmra.mrb[2].mxu0 %vm62_vm1, %v542_v2  ;;  %3868 = vmatprep.subr.bf16.mxu1 %v4381_v0 }
 0x5c0   :  { %769 = vmatprep.mubr.bf16.mxu0 %v4386_v50 }
 0x682   :  { %v362_v3 = vpop.f32.mrb[4].mxu0  ;;  %v403_v4 = vpop.f32.mrb[4].mxu1 }
 0x683   :  { %v364_v6 = vpop.f32.mrb[5].mxu0  ;;  %v405_v8 = vpop.f32.mrb[5].mxu1 }
 0x684   :  { %v366_v9 = vpop.f32.mrb[6].mxu0  ;;  %v407_v10 = vpop.f32.mrb[6].mxu1 }
 0x685   :  { %v367_v11 = vpop.f32.mrb[7].mxu0  ;;  %v408_v12 = vpop.f32.mrb[7].mxu1 }
 0x68a   :  { %v490_v13 = vpop.f32.mrb[8].mxu0  ;;  %v531_v14 = vpop.f32.mrb[8].mxu1 }
 0x68b   :  { %v4571_v15 = vadd.f32 %v490_v13, %v362_v3  ;;  %v4573_v16 = vadd.f32 %v531_v14, %v403_v4  ;;  %v492_v17 = vpop.f32.mrb[9].mxu0  ;;  %v533_v18 = vpop.f32.mrb[9].mxu1  ;;  %v3412_v4 = vld [vmem:[%s5051_s0 + $0x6] sm:$0x3] }
 0x68c   :  { %v4575_v19 = vadd.f32 %v492_v17, %v364_v6  ;;  %v4577_v20 = vadd.f32 %v533_v18, %v405_v8  ;;  %v494_v21 = vpop.f32.mrb[10].mxu0  ;;  %v535_v22 = vpop.f32.mrb[10].mxu1 }
 0x68d   :  { %v495_v23 = vpop.f32.mrb[11].mxu0  ;;  %v536_v24 = vpop.f32.mrb[11].mxu1  ;;  %v3959_v21 = vld [vmem:[%s5053_s2 + $0xc4] ss:$16 sps:$4 sm:$0xff]   ;;  %v3960_v22 = vld [vmem:[%s5053_s2 + $0xc8] ss:$16 sps:$4 sm:$0xff]  }
 0x68e   :  { %v3962_v23 = vld [vmem:[%s5053_s2 + $0xcc] ss:$16 sps:$4 sm:$0xff]   ;;  %v3965_v24 = vld [vmem:[%s5053_s2 + $0xe4] ss:$16 sps:$4 sm:$0xff]  }
 0x692   :  { %v611_v26 = vpop.f32.mrb[2].mxu0 }
 0x693   :  { %v615_v27 = vadd.f32 %v3391_v25, %v611_v26  ;;  %v3794_v28 = vpop.f32.mrb[3].mxu0  ;;  %v3968_v25 = vld [vmem:[%s5053_s2 + $0xec] ss:$16 sps:$4 sm:$0xff]   ;;  %v3963_v26 = vld [vmem:[%s5053_s2 + $0xe0] ss:$16 sps:$4 sm:$0xff]  }
 0x695   :  { %4257 = vtanh.f32 %v615_v27  ;;  %v3393_v30 = vmul.f32 -1.442695, %v615_v27  ;;  %v3966_v27 = vld [vmem:[%s5053_s2 + $0xe8] ss:$16 sps:$4 sm:$0xff]  }
 0x697   :  { %4259 = vpow2.f32 %v3393_v30 }
 0x69f   :  { %v4258_v29 = vpop.eup %4257 }
 0x6a0   :  { %625 = vrot.lane.b32.xlu0 %v4258_v29, %s4384_s1 }
 0x6a1   :  { %v4260_v31 = vpop.eup %4259 }
 0x6a2   :  { %v619_v32 = vadd.f32 1.0, %v4260_v31 }
 0x6a4   :  { %4261 = vrcp.f32 %v619_v32 }
 0x6ae   :  { %v4262_v33 = vpop.eup %4261 }
 0x6af   :  { %v623_v36 = vmul.f32 %v4262_v33, %v4499_v39  ;;  %v3950_v39 = vld [vmem:[%s5053_s2 + $0x8c] ss:$16 sps:$4 sm:$0xff]  }
 0x6b0   :  { %737 = vmatprep.subr.bf16.mxu0 %v3950_v39 }
 0x6b1   :  { %738 = vmatpush1.bf16.msra.mxu0 %v3948_v42 }
 0x6b2   :  { %739 = vmatprep.subr.bf16.mxu0 %v3956_v44 }
 0x6b5   :  { %740 = vmatpush1.bf16.msra.mxu0 %v3954_v46  ;;  %v3433_v46 = vld [vmem:[%s5051_s0 + $0x8] sm:$0x3] }
 0x6b6   :  { %940 = vmatprep.subr.bf16.mxu0 %v3959_v21 }
 0x712   :  { %v626_v34 = vpop.permute.xlu0 %625 }
 0x713   :  { %v628_v35 = vmul.f32 %v4262_v33, %v626_v34 }
 0x715   :  { %630 = vrot.lane.b32.xlu1 %v628_v35, %s4385_s17 }
 0x787   :  { %v631_v37 = vpop.permute.xlu1 %630 }
 0x788   :  { %v4585_v38 = vadd.f32 %v631_v37, %v623_v36 }
 0x78a   :  { %4263 = vtanh.f32 %v4585_v38 }
 0x794   :  { %v4264_v47 = vpop.eup %4263 }
 0x795   :  { %636 = vrot.lane.b32.xlu0 %v4264_v47, %s4384_s1 }
 0x807   :  { %v637_v48 = vpop.permute.xlu0 %636 }
 0x808   :  { %v639_v49 = vmul.f32 %v4262_v33, %v637_v48 }
 0x80a   :  { %v640_v51 = vpack.c.bf16 %v639_v49, %v639_v49  ;;  %785 = vrot.lane.b32.xlu0 %v639_v49, %s4385_s17 }
 0x80c   :  { %651 = vrot.lane.b32.xlu1 %v640_v51, %s4385_s17 }
 0x87c   :  { %v786_v53 = vpop.permute.xlu0 %785 }
 0x87e   :  { %v652_v52 = vpop.permute.xlu1 %651 }
 0x87f   :  { %3410 = vmatmul.mubr.msk.bf16.vlgmr.msra.gmra.mrb[12].mxu1 %vm62_vm1, %v652_v52  ;;  %3411 = vmatmul.mubr.msk.bf16.vlgmr.msra.gmra.mrb[12].mxu0 %vm62_vm1, %v652_v52 }
 0x880   :  { %3870 = vmatpush3.bf16.msra.mxu1 %v4472_v5  ;;  %3803 = vmatprep.mubr.msk.f32.mxu1 %vm4382_vm0, %v4383_v1 }
 0x881   :  { %3871 = vmatprep.subr.bf16.mxu1 %v4381_v0  ;;  %972 = vmatprep.mubr.bf16.mxu0 %v4386_v50 }
 0x884   :  { %3873 = vmatpush3.bf16.msra.mxu1 %v4478_v7 }
 0x885   :  { %981 = vmatprep.subr.bf16.mxu1 %v3962_v23 }
 0x887   :  { %3804 = vmatmul.mubr.msk.f32.vlgmr.msra.gmra.mrb[2].mxu1 %vm62_vm1, %v786_v53 }
 0x888   :  { %1013 = vmatprep.mubr.bf16.mxu1 %v4386_v50  ;;  %982 = vmatpush1.bf16.msra.mxu1 %v3960_v22 }
 0x889   :  { %983 = vmatprep.subr.bf16.mxu1 %v3968_v25 }
 0x88c   :  { %984 = vmatpush1.bf16.msra.mxu1 %v3966_v27  ;;  %v3454_v27 = vld [vmem:[%s5051_s0 + $0xa] sm:$0x3] }
 0x952   :  { %v730_v54 = vpop.f32.mrb[12].mxu1  ;;  %v771_v55 = vpop.f32.mrb[12].mxu0 }
 0x953   :  { %v4627_v56 = vadd.f32 %v730_v54, %v4571_v15  ;;  %v4630_v57 = vadd.f32 %v771_v55, %v4573_v16  ;;  %v732_v58 = vpop.f32.mrb[13].mxu1  ;;  %v773_v59 = vpop.f32.mrb[13].mxu0 }
 0x954   :  { %v4633_v60 = vadd.f32 %v732_v58, %v4575_v19  ;;  %v4636_v61 = vadd.f32 %v773_v59, %v4577_v20  ;;  %v734_v62 = vpop.f32.mrb[14].mxu1  ;;  %v775_v63 = vpop.f32.mrb[14].mxu0  ;;  %v3957_v20 = vld [vmem:[%s5053_s2 + $0xc0] ss:$16 sps:$4 sm:$0xff]  }
 0x955   :  { %v735_v2 = vpop.f32.mrb[15].mxu1  ;;  %v776_v3 = vpop.f32.mrb[15].mxu0  ;;  %941 = vmatpush1.bf16.msra.mxu0 %v3957_v20  ;;  %v3971_v62 = vld [vmem:[%s5053_s2 + $0x104] ss:$16 sps:$4 sm:$0xff]   ;;  %v3972_v63 = vld [vmem:[%s5053_s2 + $0x108] ss:$16 sps:$4 sm:$0xff]  }
 0x956   :  { %942 = vmatprep.subr.bf16.mxu0 %v3965_v24  ;;  %v3974_v2 = vld [vmem:[%s5053_s2 + $0x10c] ss:$16 sps:$4 sm:$0xff]   ;;  %v3977_v3 = vld [vmem:[%s5053_s2 + $0x124] ss:$16 sps:$4 sm:$0xff]   ;;  %1184 = vmatprep.subr.bf16.mxu1 %v3971_v62 }
 0x959   :  { %943 = vmatpush1.bf16.msra.mxu0 %v3963_v26 }
 0x95a   :  { %v855_v6 = vpop.f32.mrb[2].mxu1  ;;  %3874 = vmatprep.subr.bf16.mxu0 %v4381_v0 }
 0x95b   :  { %v859_v8 = vadd.f32 %v3412_v4, %v855_v6  ;;  %v3805_v9 = vpop.f32.mrb[3].mxu1  ;;  %v3980_v4 = vld [vmem:[%s5053_s2 + $0x12c] ss:$16 sps:$4 sm:$0xff]   ;;  %v3975_v6 = vld [vmem:[%s5053_s2 + $0x120] ss:$16 sps:$4 sm:$0xff]  }
 0x95d   :  { %4265 = vtanh.f32 %v859_v8  ;;  %v3414_v11 = vmul.f32 -1.442695, %v859_v8  ;;  %v3978_v8 = vld [vmem:[%s5053_s2 + $0x128] ss:$16 sps:$4 sm:$0xff]  }
 0x95f   :  { %4267 = vpow2.f32 %v3414_v11 }
 0x967   :  { %v4266_v10 = vpop.eup %4265 }
 0x968   :  { %869 = vrot.lane.b32.xlu1 %v4266_v10, %s4384_s1 }
 0x969   :  { %v4268_v12 = vpop.eup %4267 }
 0x96a   :  { %v863_v13 = vadd.f32 1.0, %v4268_v12 }
 0x96c   :  { %4269 = vrcp.f32 %v863_v13 }
 0x976   :  { %v4270_v14 = vpop.eup %4269 }
 0x977   :  { %v867_v17 = vmul.f32 %v4270_v14, %v4585_v38 }
 0x9da   :  { %v870_v15 = vpop.permute.xlu1 %869 }
 0x9db   :  { %v872_v16 = vmul.f32 %v4270_v14, %v870_v15 }
 0x9dd   :  { %874 = vrot.lane.b32.xlu0 %v872_v16, %s4385_s17 }
 0xa4f   :  { %v875_v18 = vpop.permute.xlu0 %874 }
 0xa50   :  { %v4644_v19 = vadd.f32 %v875_v18, %v867_v17 }
 0xa52   :  { %4271 = vtanh.f32 %v4644_v19 }
 0xa5c   :  { %v4272_v28 = vpop.eup %4271 }
 0xa5d   :  { %880 = vrot.lane.b32.xlu1 %v4272_v28, %s4384_s1 }
 0xacf   :  { %v881_v29 = vpop.permute.xlu1 %880 }
 0xad0   :  { %v883_v30 = vmul.f32 %v4270_v14, %v881_v29 }
 0xad2   :  { %v884_v31 = vpack.c.bf16 %v883_v30, %v883_v30  ;;  %1029 = vrot.lane.b32.xlu1 %v883_v30, %s4385_s17 }
 0xad4   :  { %895 = vrot.lane.b32.xlu0 %v884_v31, %s4385_s17 }
 0xb44   :  { %v1030_v33 = vpop.permute.xlu1 %1029 }
 0xb46   :  { %v896_v32 = vpop.permute.xlu0 %895 }
 0xb47   :  { %3431 = vmatmul.mubr.msk.bf16.vlgmr.msra.gmra.mrb[16].mxu0 %vm62_vm1, %v896_v32  ;;  %3432 = vmatmul.mubr.msk.bf16.vlgmr.msra.gmra.mrb[16].mxu1 %vm62_vm1, %v896_v32 }
 0xb48   :  { %3876 = vmatpush3.bf16.msra.mxu0 %v4472_v5  ;;  %3814 = vmatprep.mubr.msk.f32.mxu0 %vm4382_vm0, %v4383_v1 }
 0xb49   :  { %3877 = vmatprep.subr.bf16.mxu0 %v4381_v0  ;;  %1216 = vmatprep.mubr.bf16.mxu1 %v4386_v50 }
 0xb4c   :  { %3879 = vmatpush3.bf16.msra.mxu0 %v4478_v7 }
 0xb4d   :  { %1225 = vmatprep.subr.bf16.mxu0 %v3974_v2 }
 0xb4f   :  { %3815 = vmatmul.mubr.msk.f32.vlgmr.msra.gmra.mrb[20].mxu0 %vm62_vm1, %v1030_v33 }
 0xb50   :  { %1257 = vmatprep.mubr.bf16.mxu0 %v4386_v50  ;;  %1226 = vmatpush1.bf16.msra.mxu0 %v3972_v63 }
 0xb51   :  { %1227 = vmatprep.subr.bf16.mxu0 %v3980_v4 }
 0xb54   :  { %1228 = vmatpush1.bf16.msra.mxu0 %v3978_v8  ;;  %v3475_v8 = vld [vmem:[%s5051_s0 + $0xc] sm:$0x3] }
 0xc1a   :  { %v974_v34 = vpop.f32.mrb[16].mxu0  ;;  %v1015_v35 = vpop.f32.mrb[16].mxu1 }
 0xc1b   :  { %v4686_v36 = vadd.f32 %v974_v34, %v4627_v56  ;;  %v4689_v37 = vadd.f32 %v1015_v35, %v4630_v57  ;;  %v976_v38 = vpop.f32.mrb[17].mxu0  ;;  %v1017_v40 = vpop.f32.mrb[17].mxu1 }
 0xc1c   :  { %v4692_v41 = vadd.f32 %v976_v38, %v4633_v60  ;;  %v4695_v42 = vadd.f32 %v1017_v40, %v4636_v61  ;;  %v978_v39 = vpop.f32.mrb[18].mxu0  ;;  %v1019_v43 = vpop.f32.mrb[18].mxu1  ;;  %v3969_v61 = vld [vmem:[%s5053_s2 + $0x100] ss:$16 sps:$4 sm:$0xff]  }
 0xc1d   :  { %v979_v44 = vpop.f32.mrb[19].mxu0  ;;  %v1020_v45 = vpop.f32.mrb[19].mxu1  ;;  %1185 = vmatpush1.bf16.msra.mxu1 %v3969_v61  ;;  %v3983_v39 = vld [vmem:[%s5053_s2 + $0x144] ss:$16 sps:$4 sm:$0xff]   ;;  %v3984_v43 = vld [vmem:[%s5053_s2 + $0x148] ss:$16 sps:$4 sm:$0xff]  }
 0xc1e   :  { %1186 = vmatprep.subr.bf16.mxu1 %v3977_v3  ;;  %v3986_v44 = vld [vmem:[%s5053_s2 + $0x14c] ss:$16 sps:$4 sm:$0xff]   ;;  %v3989_v45 = vld [vmem:[%s5053_s2 + $0x164] ss:$16 sps:$4 sm:$0xff]   ;;  %1428 = vmatprep.subr.bf16.mxu0 %v3983_v39 }
 0xc21   :  { %1187 = vmatpush1.bf16.msra.mxu1 %v3975_v6 }
 0xc22   :  { %v1099_v47 = vpop.f32.mrb[20].mxu0  ;;  %3880 = vmatprep.subr.bf16.mxu1 %v4381_v0 }
 0xc23   :  { %v1103_v48 = vadd.f32 %v3433_v46, %v1099_v47  ;;  %v3816_v49 = vpop.f32.mrb[21].mxu0  ;;  %v3992_v46 = vld [vmem:[%s5053_s2 + $0x16c] ss:$16 sps:$4 sm:$0xff]   ;;  %v3987_v47 = vld [vmem:[%s5053_s2 + $0x160] ss:$16 sps:$4 sm:$0xff]  }
 0xc25   :  { %4273 = vtanh.f32 %v1103_v48  ;;  %v3435_v52 = vmul.f32 -1.442695, %v1103_v48  ;;  %v3990_v48 = vld [vmem:[%s5053_s2 + $0x168] ss:$16 sps:$4 sm:$0xff]  }
 0xc27   :  { %4275 = vpow2.f32 %v3435_v52 }
 0xc2f   :  { %v4274_v51 = vpop.eup %4273 }
 0xc30   :  { %1113 = vrot.lane.b32.xlu0 %v4274_v51, %s4384_s1 }
 0xc31   :  { %v4276_v53 = vpop.eup %4275 }
 0xc32   :  { %v1107_v54 = vadd.f32 1.0, %v4276_v53 }
 0xc34   :  { %4277 = vrcp.f32 %v1107_v54 }
 0xc3e   :  { %v4278_v55 = vpop.eup %4277 }
 0xc3f   :  { %v1111_v58 = vmul.f32 %v4278_v55, %v4644_v19 }
 0xca2   :  { %v1114_v56 = vpop.permute.xlu0 %1113 }
 0xca3   :  { %v1116_v57 = vmul.f32 %v4278_v55, %v1114_v56 }
 0xca5   :  { %1118 = vrot.lane.b32.xlu1 %v1116_v57, %s4385_s17 }
 0xd17   :  { %v1119_v59 = vpop.permute.xlu1 %1118 }
 0xd18   :  { %v4703_v60 = vadd.f32 %v1119_v59, %v1111_v58 }
 0xd1a   :  { %4279 = vtanh.f32 %v4703_v60 }
 0xd24   :  { %v4280_v9 = vpop.eup %4279 }
 0xd25   :  { %1124 = vrot.lane.b32.xlu0 %v4280_v9, %s4384_s1 }
 0xd97   :  { %v1125_v10 = vpop.permute.xlu0 %1124 }
 0xd98   :  { %v1127_v11 = vmul.f32 %v4278_v55, %v1125_v10 }
 0xd9a   :  { %v1128_v12 = vpack.c.bf16 %v1127_v11, %v1127_v11  ;;  %1273 = vrot.lane.b32.xlu0 %v1127_v11, %s4385_s17 }
 0xd9c   :  { %1139 = vrot.lane.b32.xlu1 %v1128_v12, %s4385_s17 }
 0xe0c   :  { %v1274_v14 = vpop.permute.xlu0 %1273 }
 0xe0e   :  { %v1140_v13 = vpop.permute.xlu1 %1139 }
 0xe0f   :  { %3452 = vmatmul.mubr.msk.bf16.vlgmr.msra.gmra.mrb[20].mxu1 %vm62_vm1, %v1140_v13  ;;  %3453 = vmatmul.mubr.msk.bf16.vlgmr.msra.gmra.mrb[24].mxu0 %vm62_vm1, %v1140_v13 }
 0xe10   :  { %3882 = vmatpush3.bf16.msra.mxu1 %v4472_v5  ;;  %3825 = vmatprep.mubr.msk.f32.mxu1 %vm4382_vm0, %v4383_v1 }
 0xe11   :  { %3883 = vmatprep.subr.bf16.mxu1 %v4381_v0  ;;  %1460 = vmatprep.mubr.bf16.mxu0 %v4386_v50 }
 0xe14   :  { %3885 = vmatpush3.bf16.msra.mxu1 %v4478_v7 }
 0xe15   :  { %1469 = vmatprep.subr.bf16.mxu1 %v3986_v44 }
 0xe17   :  { %3826 = vmatmul.mubr.msk.f32.vlgmr.msra.gmra.mrb[24].mxu1 %vm62_vm1, %v1274_v14 }
 0xe18   :  { %1501 = vmatprep.mubr.bf16.mxu1 %v4386_v50  ;;  %1470 = vmatpush1.bf16.msra.mxu1 %v3984_v43  ;;  %v3496_v43 = vld [vmem:[%s5051_s0 + $0xe] sm:$0x3]  ;;  %s3349_s0 = sshll.u32 %s4387_s29, 4  ;;  %s3350_s0 = int_to_ptr.vmem [resolvable:$true] %s3349_s0 }
 0xe19   :  { %1471 = vmatprep.subr.bf16.mxu1 %v3992_v46  ;;  %s4349_s4 = scalar_lea.vmem %s3350_s0, 32  ;;  %p4354_p3 = scmp.lt.s32.totalorder %s3350_s0, %s3350_s0 }
 0xe1a   :  { %p4350_p2 = scmp.ne.s32.totalorder %s3350_s0, %s4349_s4  ;;  %p4355_p4 = scmp.lt.s32.totalorder %s4349_s4, %s4349_s4 }
 0xe1c   :  { %1472 = vmatpush1.bf16.msra.mxu1 %v3990_v48  ;;  %p4356_p5 = por %p4355_p4, %p4354_p3 }
 0xe1e   :  { %p4357_p6 = pnand %p4356_p5, %p4350_p2 }
 0xee2   :  { %v1218_v15 = vpop.f32.mrb[20].mxu1  ;;  %v1259_v16 = vpop.f32.mrb[24].mxu0 }
 0xee3   :  { %v4745_v17 = vadd.f32 %v1218_v15, %v4686_v36  ;;  %v4748_v18 = vadd.f32 %v1259_v16, %v4689_v37  ;;  %v1220_v19 = vpop.f32.mrb[21].mxu1  ;;  %v1261_v20 = vpop.f32.mrb[25].mxu0 }
 0xee4   :  { %v4751_v21 = vadd.f32 %v1220_v19, %v4692_v41  ;;  %v4754_v22 = vadd.f32 %v1261_v20, %v4695_v42  ;;  %v1222_v23 = vpop.f32.mrb[22].mxu1  ;;  %v1263_v24 = vpop.f32.mrb[26].mxu0  ;;  %v3981_v42 = vld [vmem:[%s5053_s2 + $0x140] ss:$16 sps:$4 sm:$0xff]  }
 0xee5   :  { %v1223_v25 = vpop.f32.mrb[23].mxu1  ;;  %v1264_v26 = vpop.f32.mrb[27].mxu0  ;;  %1429 = vmatpush1.bf16.msra.mxu0 %v3981_v42  ;;  %v3995_v23 = vld [vmem:[%s5053_s2 + $0x184] ss:$16 sps:$4 sm:$0xff]   ;;  %v3996_v24 = vld [vmem:[%s5053_s2 + $0x188] ss:$16 sps:$4 sm:$0xff]  }
 0xee6   :  { %1430 = vmatprep.subr.bf16.mxu0 %v3989_v45  ;;  %v3998_v25 = vld [vmem:[%s5053_s2 + $0x18c] ss:$16 sps:$4 sm:$0xff]   ;;  %v4001_v26 = vld [vmem:[%s5053_s2 + $0x1a4] ss:$16 sps:$4 sm:$0xff]   ;;  %1672 = vmatprep.subr.bf16.mxu1 %v3995_v23 }
 0xee7   :  { %v4037_v23 = vld [vmem:[#allocation2 + $0x64] ss:$16 sps:$4 sm:$0xff]  }
 0xee9   :  { %1431 = vmatpush1.bf16.msra.mxu0 %v3987_v47 }
 0xeea   :  { %v1343_v28 = vpop.f32.mrb[24].mxu1  ;;  %3886 = vmatprep.subr.bf16.mxu0 %v4381_v0 }
 0xeeb   :  { %v1347_v29 = vadd.f32 %v3454_v27, %v1343_v28  ;;  %v3827_v30 = vpop.f32.mrb[25].mxu1  ;;  %v4004_v27 = vld [vmem:[%s5053_s2 + $0x1ac] ss:$16 sps:$4 sm:$0xff]   ;;  %v3999_v28 = vld [vmem:[%s5053_s2 + $0x1a0] ss:$16 sps:$4 sm:$0xff]  }
 0xeed   :  { %4281 = vtanh.f32 %v1347_v29  ;;  %v3456_v32 = vmul.f32 -1.442695, %v1347_v29  ;;  %v4002_v29 = vld [vmem:[%s5053_s2 + $0x1a8] ss:$16 sps:$4 sm:$0xff]  }
 0xeef   :  { %4283 = vpow2.f32 %v3456_v32 }
 0xef7   :  { %v4282_v31 = vpop.eup %4281 }
 0xef8   :  { %1357 = vrot.lane.b32.xlu1 %v4282_v31, %s4384_s1 }
 0xef9   :  { %v4284_v33 = vpop.eup %4283 }
 0xefa   :  { %v1351_v34 = vadd.f32 1.0, %v4284_v33 }
 0xefc   :  { %4285 = vrcp.f32 %v1351_v34 }
 0xf06   :  { %v4286_v35 = vpop.eup %4285 }
 0xf07   :  { %v1355_v38 = vmul.f32 %v4286_v35, %v4703_v60 }
 0xf6a   :  { %v1358_v36 = vpop.permute.xlu1 %1357 }
 0xf6b   :  { %v1360_v37 = vmul.f32 %v4286_v35, %v1358_v36 }
 0xf6d   :  { %1362 = vrot.lane.b32.xlu0 %v1360_v37, %s4385_s17 }
 0xfdf   :  { %v1363_v40 = vpop.permute.xlu0 %1362 }
 0xfe0   :  { %v4762_v41 = vadd.f32 %v1363_v40, %v1355_v38 }
 0xfe2   :  { %4287 = vtanh.f32 %v4762_v41 }
 0xfec   :  { %v4288_v49 = vpop.eup %4287 }
 0xfed   :  { %1368 = vrot.lane.b32.xlu1 %v4288_v49, %s4384_s1 }
0x105f   :  { %v1369_v51 = vpop.permute.xlu1 %1368 }
0x1060   :  { %v1371_v52 = vmul.f32 %v4286_v35, %v1369_v51 }
0x1062   :  { %v1372_v53 = vpack.c.bf16 %v1371_v52, %v1371_v52  ;;  %1517 = vrot.lane.b32.xlu1 %v1371_v52, %s4385_s17 }
0x1064   :  { %1383 = vrot.lane.b32.xlu0 %v1372_v53, %s4385_s17 }
0x10d4   :  { %v1518_v55 = vpop.permute.xlu1 %1517 }
0x10d6   :  { %v1384_v54 = vpop.permute.xlu0 %1383 }
0x10d7   :  { %3473 = vmatmul.mubr.msk.bf16.vlgmr.msra.gmra.mrb[28].mxu0 %vm62_vm1, %v1384_v54  ;;  %3474 = vmatmul.mubr.msk.bf16.vlgmr.msra.gmra.mrb[28].mxu1 %vm62_vm1, %v1384_v54 }
0x10d8   :  { %3888 = vmatpush3.bf16.msra.mxu0 %v4472_v5  ;;  %3836 = vmatprep.mubr.msk.f32.mxu0 %vm4382_vm0, %v4383_v1 }
0x10d9   :  { %3889 = vmatprep.subr.bf16.mxu0 %v4381_v0  ;;  %1704 = vmatprep.mubr.bf16.mxu1 %v4386_v50 }
0x10dc   :  { %3891 = vmatpush3.bf16.msra.mxu0 %v4478_v7 }
0x10dd   :  { %1713 = vmatprep.subr.bf16.mxu0 %v3998_v25  ;;  %v4035_v25 = vld [vmem:[#allocation2 + $0x60] ss:$16 sps:$4 sm:$0xff]  }
0x10df   :  { %3837 = vmatmul.mubr.msk.f32.vlgmr.msra.gmra.mrb[22].mxu0 %vm62_vm1, %v1518_v55 }
0x10e0   :  { %1745 = vmatprep.mubr.bf16.mxu0 %v4386_v50  ;;  %1714 = vmatpush1.bf16.msra.mxu0 %v3996_v24  ;;  %v4040_v24 = vld [vmem:[#allocation2 + $0x6c] ss:$16 sps:$4 sm:$0xff]  }
0x10e1   :  { %1715 = vmatprep.subr.bf16.mxu0 %v4004_v27  ;;  %v4043_v27 = vld [vmem:[#allocation2 + $0x84] ss:$16 sps:$4 sm:$0xff]  }
0x10e4   :  { %1716 = vmatpush1.bf16.msra.mxu0 %v4002_v29  ;;  %v4041_v29 = vld [vmem:[#allocation2 + $0x80] ss:$16 sps:$4 sm:$0xff]  }
0x11aa   :  { %v1462_v56 = vpop.f32.mrb[28].mxu0  ;;  %v1503_v57 = vpop.f32.mrb[28].mxu1 }
0x11ab   :  { %v4804_v58 = vadd.f32 %v1462_v56, %v4745_v17  ;;  %v4807_v59 = vadd.f32 %v1503_v57, %v4748_v18  ;;  %v1464_v60 = vpop.f32.mrb[29].mxu0  ;;  %v1505_v61 = vpop.f32.mrb[29].mxu1 }
0x11ac   :  { %v4810_v62 = vadd.f32 %v1464_v60, %v4751_v21  ;;  %v4813_v63 = vadd.f32 %v1505_v61, %v4754_v22  ;;  %v1466_v2 = vpop.f32.mrb[30].mxu0  ;;  %v1507_v3 = vpop.f32.mrb[30].mxu1  ;;  %v3993_v22 = vld [vmem:[%s5053_s2 + $0x180] ss:$16 sps:$4 sm:$0xff]   ;;  %v4008_v60 = vld [vmem:[%s5053_s2 + $0x1c8] ss:$16 sps:$4 sm:$0xff]  }
0x11ad   :  { %v1467_v4 = vpop.f32.mrb[31].mxu0  ;;  %v1508_v6 = vpop.f32.mrb[31].mxu1  ;;  %1673 = vmatpush1.bf16.msra.mxu1 %v3993_v22  ;;  %v4010_v61 = vld [vmem:[%s5053_s2 + $0x1cc] ss:$16 sps:$4 sm:$0xff]   ;;  %v4011_v2 = vld [vmem:[%s5053_s2 + $0x1e0] ss:$16 sps:$4 sm:$0xff]  }
0x11ae   :  { %1674 = vmatprep.subr.bf16.mxu1 %v4001_v26  ;;  %v4014_v3 = vld [vmem:[%s5053_s2 + $0x1e8] ss:$16 sps:$4 sm:$0xff]   ;;  %v4019_v6 = vld [vmem:[#allocation2 + $0x4] ss:$16 sps:$4 sm:$0xff]  }
0x11af   :  { %v4032_v22 = vld [vmem:[#allocation2 + $0x48] ss:$16 sps:$4 sm:$0xff]  }
0x11b0   :  { %v4038_v26 = vld [vmem:[#allocation2 + $0x68] ss:$16 sps:$4 sm:$0xff]  }
0x11b1   :  { %1675 = vmatpush1.bf16.msra.mxu1 %v3999_v28  ;;  %v4046_v28 = vld [vmem:[#allocation2 + $0x8c] ss:$16 sps:$4 sm:$0xff]  }
0x11b2   :  { %v1587_v9 = vpop.f32.mrb[22].mxu0  ;;  %3892 = vmatprep.subr.bf16.mxu1 %v4381_v0 }
0x11b3   :  { %v1591_v10 = vadd.f32 %v3475_v8, %v1587_v9  ;;  %v3838_v11 = vpop.f32.mrb[23].mxu0  ;;  %v4022_v8 = vld [vmem:[#allocation2 + $0xc] ss:$16 sps:$4 sm:$0xff]  }
0x11b5   :  { %4289 = vtanh.f32 %v1591_v10  ;;  %v3477_v13 = vmul.f32 -1.442695, %v1591_v10 }
0x11b7   :  { %4291 = vpow2.f32 %v3477_v13  ;;  %v4020_v13 = vld [vmem:[#allocation2 + $0x8] ss:$16 sps:$4 sm:$0xff]  }
0x11bf   :  { %v4290_v12 = vpop.eup %4289 }
0x11c0   :  { %1601 = vrot.lane.b32.xlu0 %v4290_v12, %s4384_s1  ;;  %v4017_v12 = vld [vmem:[#allocation2] ss:$16 sps:$4 sm:$0xff]  }
0x11c1   :  { %v4292_v14 = vpop.eup %4291 }
0x11c2   :  { %v1595_v15 = vadd.f32 1.0, %v4292_v14  ;;  %v4025_v14 = vld [vmem:[#allocation2 + $0x24] ss:$16 sps:$4 sm:$0xff]  }
0x11c4   :  { %4293 = vrcp.f32 %v1595_v15  ;;  %v4028_v15 = vld [vmem:[#allocation2 + $0x2c] ss:$16 sps:$4 sm:$0xff]  }
0x11ce   :  { %v4294_v16 = vpop.eup %4293 }
0x11cf   :  { %v1599_v19 = vmul.f32 %v4294_v16, %v4762_v41 }
0x1232   :  { %v1602_v17 = vpop.permute.xlu0 %1601 }
0x1233   :  { %v1604_v18 = vmul.f32 %v4294_v16, %v1602_v17  ;;  %v4023_v17 = vld [vmem:[#allocation2 + $0x20] ss:$16 sps:$4 sm:$0xff]  }
0x1235   :  { %1606 = vrot.lane.b32.xlu1 %v1604_v18, %s4385_s17  ;;  %v4026_v18 = vld [vmem:[#allocation2 + $0x28] ss:$16 sps:$4 sm:$0xff]  }
0x12a7   :  { %v1607_v20 = vpop.permute.xlu1 %1606 }
0x12a8   :  { %v4821_v21 = vadd.f32 %v1607_v20, %v1599_v19  ;;  %v4031_v19 = vld [vmem:[#allocation2 + $0x44] ss:$16 sps:$4 sm:$0xff]   ;;  %v4034_v20 = vld [vmem:[#allocation2 + $0x4c] ss:$16 sps:$4 sm:$0xff]  }
0x12aa   :  { %4295 = vtanh.f32 %v4821_v21 }
0x12b4   :  { %v4296_v30 = vpop.eup %4295 }
0x12b5   :  { %1612 = vrot.lane.b32.xlu0 %v4296_v30, %s4384_s1  ;;  %v4044_v30 = vld [vmem:[#allocation2 + $0x88] ss:$16 sps:$4 sm:$0xff]  }
0x1327   :  { %v1613_v31 = vpop.permute.xlu0 %1612 }
0x1328   :  { %v1615_v32 = vmul.f32 %v4294_v16, %v1613_v31  ;;  %v4049_v31 = vld [vmem:[#allocation2 + $0xa4] ss:$16 sps:$4 sm:$0xff]  }
0x132a   :  { %v1616_v33 = vpack.c.bf16 %v1615_v32, %v1615_v32  ;;  %1761 = vrot.lane.b32.xlu0 %v1615_v32, %s4385_s17  ;;  %v4052_v32 = vld [vmem:[#allocation2 + $0xac] ss:$16 sps:$4 sm:$0xff]  }
0x132c   :  { %1627 = vrot.lane.b32.xlu1 %v1616_v33, %s4385_s17  ;;  %v4047_v33 = vld [vmem:[#allocation2 + $0xa0] ss:$16 sps:$4 sm:$0xff]  }
0x139c   :  { %v1762_v35 = vpop.permute.xlu0 %1761 }
0x139e   :  { %v1628_v34 = vpop.permute.xlu1 %1627 }
0x139f   :  { %3494 = vmatmul.mubr.msk.bf16.vlgmr.msra.gmra.mrb[32].mxu1 %vm62_vm1, %v1628_v34  ;;  %3495 = vmatmul.mubr.msk.bf16.vlgmr.msra.gmra.mrb[32].mxu0 %vm62_vm1, %v1628_v34  ;;  %v4050_v34 = vld [vmem:[#allocation2 + $0xa8] ss:$16 sps:$4 sm:$0xff]  }
0x13a0   :  { %3894 = vmatpush3.bf16.msra.mxu1 %v4472_v5  ;;  %3847 = vmatprep.mubr.msk.f32.mxu1 %vm4382_vm0, %v4383_v1 }
0x13a1   :  { %3895 = vmatprep.subr.bf16.mxu1 %v4381_v0  ;;  %1948 = vmatprep.mubr.bf16.mxu0 %v4386_v50 }
0x13a4   :  { %3897 = vmatpush3.bf16.msra.mxu1 %v4478_v7 }
0x13a5   :  { %1957 = vmatprep.subr.bf16.mxu1 %v4010_v61  ;;  %v4089_v61 = vld [vmem:[#allocation2 + $0x180] ss:$16 sps:$4 sm:$0xff]  }
0x13a7   :  { %3848 = vmatmul.mubr.msk.f32.vlgmr.msra.gmra.mrb[26].mxu1 %vm62_vm1, %v1762_v35  ;;  %v4055_v35 = vld [vmem:[#allocation2 + $0xc4] ss:$16 sps:$4 sm:$0xff]  }
0x13a8   :  { %1989 = vmatprep.mubr.bf16.mxu1 %v4386_v50  ;;  %1958 = vmatpush1.bf16.msra.mxu1 %v4008_v60  ;;  %v4094_v60 = vld [vmem:[#allocation2 + $0x18c] ss:$16 sps:$4 sm:$0xff]  }
0x1472   :  { %v1706_v36 = vpop.f32.mrb[32].mxu1  ;;  %v1747_v37 = vpop.f32.mrb[32].mxu0 }
0x1473   :  { %v4863_v38 = vadd.f32 %v1706_v36, %v4804_v58  ;;  %v4866_v5 = vadd.f32 %v1747_v37, %v4807_v59  ;;  %v1708_v1 = vpop.f32.mrb[33].mxu1  ;;  %v1749_v40 = vpop.f32.mrb[33].mxu0  ;;  %v4005_v58 = vld [vmem:[%s5053_s2 + $0x1c0] ss:$16 sps:$4 sm:$0xff]   ;;  %v4007_v59 = vld [vmem:[%s5053_s2 + $0x1c4] ss:$16 sps:$4 sm:$0xff]  }
0x1474   :  { %v4869_v0 = vadd.f32 %v1708_v1, %v4810_v62  ;;  %v4872_v7 = vadd.f32 %v1749_v40, %v4813_v63  ;;  %v1710_v41 = vpop.f32.mrb[34].mxu1  ;;  %v1751_v42 = vpop.f32.mrb[34].mxu0  ;;  %v4013_v62 = vld [vmem:[%s5053_s2 + $0x1e4] ss:$16 sps:$4 sm:$0xff]   ;;  %1916 = vmatprep.subr.bf16.mxu0 %v4007_v59  ;;  %v4016_v63 = vld [vmem:[%s5053_s2 + $0x1ec] ss:$16 sps:$4 sm:$0xff]  }
0x1475   :  { %v1711_v39 = vpop.f32.mrb[35].mxu1  ;;  %v1752_v50 = vpop.f32.mrb[35].mxu0  ;;  %1917 = vmatpush1.bf16.msra.mxu0 %v4005_v58  ;;  %1959 = vmatprep.subr.bf16.mxu1 %v4016_v63  ;;  %v4058_v36 = vld [vmem:[#allocation2 + $0xcc] ss:$16 sps:$4 sm:$0xff]   ;;  %v4053_v37 = vld [vmem:[#allocation2 + $0xc0] ss:$16 sps:$4 sm:$0xff]  }
0x1476   :  { %1918 = vmatprep.subr.bf16.mxu0 %v4013_v62  ;;  %1960 = vmatpush1.bf16.msra.mxu1 %v4014_v3  ;;  %v4056_v1 = vld [vmem:[#allocation2 + $0xc8] ss:$16 sps:$4 sm:$0xff]   ;;  %v4061_v40 = vld [vmem:[#allocation2 + $0xe4] ss:$16 sps:$4 sm:$0xff]   ;;  %v4064_v41 = vld [vmem:[#allocation2 + $0xec] ss:$16 sps:$4 sm:$0xff]  }
0x1477   :  { %2908 = vmatprep.subr.bf16.mxu1 %v4022_v8  ;;  %v4059_v42 = vld [vmem:[#allocation2 + $0xe0] ss:$16 sps:$4 sm:$0xff]   ;;  %v4062_v39 = vld [vmem:[#allocation2 + $0xe8] ss:$16 sps:$4 sm:$0xff]   ;;  %v4067_v50 = vld [vmem:[#allocation2 + $0x104] ss:$16 sps:$4 sm:$0xff]  }
0x1478   :  { %v4086_v58 = vld [vmem:[#allocation2 + $0x168] ss:$16 sps:$4 sm:$0xff]   ;;  %v4091_v59 = vld [vmem:[#allocation2 + $0x184] ss:$16 sps:$4 sm:$0xff]   ;;  %v4095_v3 = vld [vmem:[#allocation2 + $0x1a0] ss:$16 sps:$4 sm:$0xff]  }
0x1479   :  { %1919 = vmatpush1.bf16.msra.mxu0 %v4011_v2  ;;  %v4092_v62 = vld [vmem:[#allocation2 + $0x188] ss:$16 sps:$4 sm:$0xff]   ;;  %v4097_v63 = vld [vmem:[#allocation2 + $0x1a4] ss:$16 sps:$4 sm:$0xff]   ;;  %v4100_v2 = vld [vmem:[#allocation2 + $0x1ac] ss:$16 sps:$4 sm:$0xff]  }
0x147a   :  { %v1831_v44 = vpop.f32.mrb[26].mxu1  ;;  %2826 = vmatprep.subr.bf16.mxu0 %v4019_v6  ;;  %v4103_v6 = vld [vmem:[#allocation2 + $0x1c4] ss:$16 sps:$4 sm:$0xff]   ;;  %v4101_v8 = vld [vmem:[#allocation2 + $0x1c0] ss:$16 sps:$4 sm:$0xff]  }
0x147b   :  { %v1835_v45 = vadd.f32 %v3496_v43, %v1831_v44  ;;  %v3849_v46 = vpop.f32.mrb[27].mxu1  ;;  %v4070_v43 = vld [vmem:[#allocation2 + $0x10c] ss:$16 sps:$4 sm:$0xff]   ;;  %v4065_v44 = vld [vmem:[#allocation2 + $0x100] ss:$16 sps:$4 sm:$0xff]  }
0x147c   :  { %v4073_v46 = vld [vmem:[#allocation2 + $0x124] ss:$16 sps:$4 sm:$0xff]  }
0x147d   :  { %4297 = vtanh.f32 %v1835_v45  ;;  %v3498_v48 = vmul.f32 -1.442695, %v1835_v45  ;;  %v4068_v45 = vld [vmem:[#allocation2 + $0x108] ss:$16 sps:$4 sm:$0xff]  }
0x147f   :  { %4299 = vpow2.f32 %v3498_v48  ;;  %v4071_v48 = vld [vmem:[#allocation2 + $0x120] ss:$16 sps:$4 sm:$0xff]  }
0x1487   :  { %v4298_v47 = vpop.eup %4297 }
0x1488   :  { %1845 = vrot.lane.b32.xlu1 %v4298_v47, %s4384_s1  ;;  %v4076_v47 = vld [vmem:[#allocation2 + $0x12c] ss:$16 sps:$4 sm:$0xff]  }
0x1489   :  { %v4300_v49 = vpop.eup %4299 }
0x148a   :  { %v1839_v51 = vadd.f32 1.0, %v4300_v49  ;;  %v4074_v49 = vld [vmem:[#allocation2 + $0x128] ss:$16 sps:$4 sm:$0xff]  }
0x148c   :  { %4301 = vrcp.f32 %v1839_v51  ;;  %v4079_v51 = vld [vmem:[#allocation2 + $0x144] ss:$16 sps:$4 sm:$0xff]  }
0x1496   :  { %v4302_v52 = vpop.eup %4301 }
0x1497   :  { %v1843_v55 = vmul.f32 %v4302_v52, %v4821_v21  ;;  %v4029_v21 = vld [vmem:[#allocation2 + $0x40] ss:$16 sps:$4 sm:$0xff]  }
0x14fa   :  { %v1846_v53 = vpop.permute.xlu1 %1845 }
0x14fb   :  { %v1848_v54 = vmul.f32 %v4302_v52, %v1846_v53  ;;  %v4077_v53 = vld [vmem:[#allocation2 + $0x140] ss:$16 sps:$4 sm:$0xff]  }
0x14fd   :  { %1850 = vrot.lane.b32.xlu0 %v1848_v54, %s4385_s17  ;;  %v4080_v54 = vld [vmem:[#allocation2 + $0x148] ss:$16 sps:$4 sm:$0xff]  }
0x156f   :  { %v1851_v56 = vpop.permute.xlu0 %1850 }
0x1570   :  { %v1853_v57 = vadd.f32 %v1851_v56, %v1843_v55  ;;  %v4085_v55 = vld [vmem:[#allocation2 + $0x164] ss:$16 sps:$4 sm:$0xff]   ;;  %v4088_v56 = vld [vmem:[#allocation2 + $0x16c] ss:$16 sps:$4 sm:$0xff]  }
0x1572   :  { %4303 = vtanh.f32 %v1853_v57  ;;  %v4083_v57 = vld [vmem:[#allocation2 + $0x160] ss:$16 sps:$4 sm:$0xff]  }
0x157c   :  { %v4304_v4 = vpop.eup %4303 }
0x157d   :  { %1856 = vrot.lane.b32.xlu1 %v4304_v4, %s4384_s1  ;;  %v4098_v4 = vld [vmem:[#allocation2 + $0x1a8] ss:$16 sps:$4 sm:$0xff]  }
0x15ef   :  { %v1857_v9 = vpop.permute.xlu1 %1856 }
0x15f0   :  { %v1859_v10 = vmul.f32 %v4302_v52, %v1857_v9  ;;  %v4082_v52 = vld [vmem:[#allocation2 + $0x14c] ss:$16 sps:$4 sm:$0xff]   ;;  %v4104_v9 = vld [vmem:[#allocation2 + $0x1c8] ss:$16 sps:$4 sm:$0xff]  }
0x15f2   :  { %v1860_v11 = vpack.c.bf16 %v1859_v10, %v1859_v10  ;;  %v4106_v10 = vld [vmem:[#allocation2 + $0x1cc] ss:$16 sps:$4 sm:$0xff]  }
0x15f4   :  { %1871 = vrot.lane.b32.xlu0 %v1860_v11, %s4385_s17  ;;  %v4109_v11 = vld [vmem:[#allocation2 + $0x1e4] ss:$16 sps:$4 sm:$0xff]  }
0x1666   :  { %v1872_v16 = vpop.permute.xlu0 %1871 }
0x1667   :  { %3515 = vmatmul.mubr.msk.bf16.vlgmr.msra.gmra.mrb[36].mxu0 %vm62_vm1, %v1872_v16  ;;  %3516 = vmatmul.mubr.msk.bf16.vlgmr.msra.gmra.mrb[36].mxu1 %vm62_vm1, %v1872_v16  ;;  %v4118_v16 = vld [vmem:[#allocation2 + $0x20c] ss:$16 sps:$4 sm:$0xff]  }
0x1668   :  { %2827 = vmatpush1.bf16.msra.mxu0 %v4017_v12  ;;  %2909 = vmatpush1.bf16.msra.mxu1 %v4020_v13  ;;  %v4112_v12 = vld [vmem:[#allocation2 + $0x1ec] ss:$16 sps:$4 sm:$0xff]   ;;  %v4107_v13 = vld [vmem:[#allocation2 + $0x1e0] ss:$16 sps:$4 sm:$0xff]  }
0x1669   :  { %2828 = vmatprep.subr.bf16.mxu0 %v4025_v14  ;;  %2910 = vmatprep.subr.bf16.mxu1 %v4028_v15  ;;  %v4110_v14 = vld [vmem:[#allocation2 + $0x1e8] ss:$16 sps:$4 sm:$0xff]   ;;  %v4115_v15 = vld [vmem:[#allocation2 + $0x204] ss:$16 sps:$4 sm:$0xff]  }
0x166c   :  { %2829 = vmatpush1.bf16.msra.mxu0 %v4023_v17  ;;  %2911 = vmatpush1.bf16.msra.mxu1 %v4026_v18  ;;  %v2004_v17 = vlaneseq }
0x166d   :  { %2830 = vmatprep.subr.bf16.mxu0 %v4031_v19  ;;  %2912 = vmatprep.subr.bf16.mxu1 %v4034_v20 }
0x166e   :  { %v4908_v18 = vshrl.u32 %v2004_v17, 7  ;;  %v4166_v17 = vld [vmem:[#allocation2 + $0x30c] ss:$16 sps:$4 sm:$0xff]  }
0x1670   :  { %2831 = vmatpush1.bf16.msra.mxu0 %v4029_v21  ;;  %2913 = vmatpush1.bf16.msra.mxu1 %v4032_v22  ;;  %v2006_v19 = vsub.s32 0, %v4908_v18  ;;  %v2014_v20 = vsub.s32 2, %v4908_v18  ;;  %v2002_v21 = vld [vmem:[%s5054_s3] sm:$0xf]  ;;  %v2010_v22 = vsub.s32 1, %v4908_v18 }
0x1671   :  { %2832 = vmatprep.subr.bf16.mxu0 %v4037_v23  ;;  %2914 = vmatprep.subr.bf16.mxu1 %v4040_v24  ;;  %v2018_v23 = vsub.s32 3, %v4908_v18 }
0x1672   :  { %v2007_v24 = vrot.slane %v2002_v21, %v2006_v19 }
0x1674   :  { %2833 = vmatpush1.bf16.msra.mxu0 %v4035_v25  ;;  %2915 = vmatpush1.bf16.msra.mxu1 %v4038_v26  ;;  %v2015_v25 = vrot.slane %v2002_v21, %v2014_v20 }
0x1675   :  { %2834 = vmatprep.subr.bf16.mxu0 %v4043_v27  ;;  %2916 = vmatprep.subr.bf16.mxu1 %v4046_v28  ;;  %v2011_v28 = vrot.slane %v2002_v21, %v2010_v22 }
0x1678   :  { %2835 = vmatpush1.bf16.msra.mxu0 %v4041_v29  ;;  %2917 = vmatpush1.bf16.msra.mxu1 %v4044_v30  ;;  %v2019_v29 = vrot.slane %v2002_v21, %v2018_v23  ;;  %v4161_v21 = vld [vmem:[#allocation2 + $0x300] ss:$16 sps:$4 sm:$0xff]  }
0x1679   :  { %2836 = vmatprep.subr.bf16.mxu0 %v4049_v31  ;;  %2918 = vmatprep.subr.bf16.mxu1 %v4052_v32 }
0x167c   :  { %2837 = vmatpush1.bf16.msra.mxu0 %v4047_v33  ;;  %2919 = vmatpush1.bf16.msra.mxu1 %v4050_v34 }
0x167d   :  { %2838 = vmatprep.subr.bf16.mxu0 %v4055_v35  ;;  %2920 = vmatprep.subr.bf16.mxu1 %v4058_v36 }
0x1680   :  { %2839 = vmatpush1.bf16.msra.mxu0 %v4053_v37  ;;  %2921 = vmatpush1.bf16.msra.mxu1 %v4056_v1 }
0x1681   :  { %2840 = vmatprep.subr.bf16.mxu0 %v4061_v40  ;;  %2922 = vmatprep.subr.bf16.mxu1 %v4064_v41 }
0x1684   :  { %2841 = vmatpush1.bf16.msra.mxu0 %v4059_v42  ;;  %2923 = vmatpush1.bf16.msra.mxu1 %v4062_v39 }
0x1685   :  { %2842 = vmatprep.subr.bf16.mxu0 %v4067_v50  ;;  %2924 = vmatprep.subr.bf16.mxu1 %v4070_v43 }
0x1688   :  { %2843 = vmatpush1.bf16.msra.mxu0 %v4065_v44  ;;  %2925 = vmatpush1.bf16.msra.mxu1 %v4068_v45 }
0x1689   :  { %2844 = vmatprep.subr.bf16.mxu0 %v4073_v46  ;;  %2926 = vmatprep.subr.bf16.mxu1 %v4076_v47  ;;  %v4116_v46 = vld [vmem:[#allocation2 + $0x208] ss:$16 sps:$4 sm:$0xff]  }
0x168c   :  { %2845 = vmatpush1.bf16.msra.mxu0 %v4071_v48  ;;  %2927 = vmatpush1.bf16.msra.mxu1 %v4074_v49  ;;  %v4119_v49 = vld [vmem:[#allocation2 + $0x220] ss:$16 sps:$4 sm:$0xff]  }
0x168d   :  { %2846 = vmatprep.subr.bf16.mxu0 %v4079_v51  ;;  %2928 = vmatprep.subr.bf16.mxu1 %v4082_v52  ;;  %v4122_v51 = vld [vmem:[#allocation2 + $0x228] ss:$16 sps:$4 sm:$0xff]   ;;  %v4127_v52 = vld [vmem:[#allocation2 + $0x244] ss:$16 sps:$4 sm:$0xff]  }
0x1690   :  { %2847 = vmatpush1.bf16.msra.mxu0 %v4077_v53  ;;  %2929 = vmatpush1.bf16.msra.mxu1 %v4080_v54  ;;  %v4130_v53 = vld [vmem:[#allocation2 + $0x24c] ss:$16 sps:$4 sm:$0xff]   ;;  %v4125_v54 = vld [vmem:[#allocation2 + $0x240] ss:$16 sps:$4 sm:$0xff]  }
0x1691   :  { %2848 = vmatprep.subr.bf16.mxu0 %v4085_v55  ;;  %2930 = vmatprep.subr.bf16.mxu1 %v4088_v56  ;;  %v4128_v55 = vld [vmem:[#allocation2 + $0x248] ss:$16 sps:$4 sm:$0xff]   ;;  %v4133_v56 = vld [vmem:[#allocation2 + $0x264] ss:$16 sps:$4 sm:$0xff]  }
0x1694   :  { %2849 = vmatpush1.bf16.msra.mxu0 %v4083_v57  ;;  %2931 = vmatpush1.bf16.msra.mxu1 %v4086_v58  ;;  %v4136_v57 = vld [vmem:[#allocation2 + $0x26c] ss:$16 sps:$4 sm:$0xff]   ;;  %v4131_v58 = vld [vmem:[#allocation2 + $0x260] ss:$16 sps:$4 sm:$0xff]  }
0x1695   :  { %2850 = vmatprep.subr.bf16.mxu0 %v4091_v59  ;;  %2932 = vmatprep.subr.bf16.mxu1 %v4094_v60  ;;  %v4134_v59 = vld [vmem:[#allocation2 + $0x268] ss:$16 sps:$4 sm:$0xff]   ;;  %v4139_v60 = vld [vmem:[#allocation2 + $0x284] ss:$16 sps:$4 sm:$0xff]  }
0x1698   :  { %2851 = vmatpush1.bf16.msra.mxu0 %v4089_v61  ;;  %2933 = vmatpush1.bf16.msra.mxu1 %v4092_v62  ;;  %v4142_v61 = vld [vmem:[#allocation2 + $0x28c] ss:$16 sps:$4 sm:$0xff]   ;;  %v4137_v62 = vld [vmem:[#allocation2 + $0x280] ss:$16 sps:$4 sm:$0xff]  }
0x1699   :  { %2852 = vmatprep.subr.bf16.mxu0 %v4097_v63  ;;  %2934 = vmatprep.subr.bf16.mxu1 %v4100_v2  ;;  %v4140_v63 = vld [vmem:[#allocation2 + $0x288] ss:$16 sps:$4 sm:$0xff]   ;;  %v4145_v2 = vld [vmem:[#allocation2 + $0x2a4] ss:$16 sps:$4 sm:$0xff]  }
0x169c   :  { %2853 = vmatpush1.bf16.msra.mxu0 %v4095_v3  ;;  %2935 = vmatpush1.bf16.msra.mxu1 %v4098_v4  ;;  %v4148_v3 = vld [vmem:[#allocation2 + $0x2ac] ss:$16 sps:$4 sm:$0xff]   ;;  %v4143_v4 = vld [vmem:[#allocation2 + $0x2a0] ss:$16 sps:$4 sm:$0xff]  }
0x169d   :  { %2854 = vmatprep.subr.bf16.mxu0 %v4103_v6  ;;  %2936 = vmatprep.subr.bf16.mxu1 %v4106_v10  ;;  %v4146_v6 = vld [vmem:[#allocation2 + $0x2a8] ss:$16 sps:$4 sm:$0xff]   ;;  %v4149_v10 = vld [vmem:[#allocation2 + $0x2c0] ss:$16 sps:$4 sm:$0xff]  }
0x16a0   :  { %2855 = vmatpush1.bf16.msra.mxu0 %v4101_v8  ;;  %2937 = vmatpush1.bf16.msra.mxu1 %v4104_v9  ;;  %v4151_v8 = vld [vmem:[#allocation2 + $0x2c4] ss:$16 sps:$4 sm:$0xff]   ;;  %v4154_v9 = vld [vmem:[#allocation2 + $0x2cc] ss:$16 sps:$4 sm:$0xff]  }
0x16a1   :  { %2856 = vmatprep.subr.bf16.mxu0 %v4109_v11  ;;  %2938 = vmatprep.subr.bf16.mxu1 %v4112_v12  ;;  %v4152_v11 = vld [vmem:[#allocation2 + $0x2c8] ss:$16 sps:$4 sm:$0xff]   ;;  %v4157_v12 = vld [vmem:[#allocation2 + $0x2e4] ss:$16 sps:$4 sm:$0xff]  }
0x16a4   :  { %2857 = vmatpush1.bf16.msra.mxu0 %v4107_v13  ;;  %2939 = vmatpush1.bf16.msra.mxu1 %v4110_v14  ;;  %v4160_v13 = vld [vmem:[#allocation2 + $0x2ec] ss:$16 sps:$4 sm:$0xff]   ;;  %v4155_v14 = vld [vmem:[#allocation2 + $0x2e0] ss:$16 sps:$4 sm:$0xff]  }
0x16a5   :  { %2867 = vmatprep.subr.bf16.mxu0 %v4115_v15  ;;  %2949 = vmatprep.subr.bf16.mxu1 %v4118_v16  ;;  %v4158_v15 = vld [vmem:[#allocation2 + $0x2e8] ss:$16 sps:$4 sm:$0xff]   ;;  %v4163_v16 = vld [vmem:[#allocation2 + $0x304] ss:$16 sps:$4 sm:$0xff]  }
0x173a   :  { %v1950_v26 = vpop.f32.mrb[36].mxu0  ;;  %v1991_v27 = vpop.f32.mrb[36].mxu1 }
0x173b   :  { %v1998_v30 = vadd.f32 %v1950_v26, %v4863_v38  ;;  %v2000_v31 = vadd.f32 %v1991_v27, %v4866_v5  ;;  %v1952_v32 = vpop.f32.mrb[37].mxu0  ;;  %v1993_v33 = vpop.f32.mrb[37].mxu1  ;;  %v4113_v5 = vld [vmem:[#allocation2 + $0x200] ss:$16 sps:$4 sm:$0xff]   ;;  %v4172_v26 = vld [vmem:[#allocation2 + $0x32c] ss:$16 sps:$4 sm:$0xff]  }
0x173c   :  { %v1999_v34 = vadd.f32 %v1952_v32, %v4869_v0  ;;  %v2001_v35 = vadd.f32 %v1993_v33, %v4872_v7  ;;  %v1954_v36 = vpop.f32.mrb[38].mxu0  ;;  %v1995_v37 = vpop.f32.mrb[38].mxu1  ;;  %v4121_v0 = vld [vmem:[#allocation2 + $0x224] ss:$16 sps:$4 sm:$0xff]   ;;  %v4124_v7 = vld [vmem:[#allocation2 + $0x22c] ss:$16 sps:$4 sm:$0xff]  }
0x173d   :  { %v2024_v1 = vadd.f32 %v2007_v24, %v1998_v30  ;;  %v4929_v40 = vadd.f32 %v2015_v25, %v2000_v31  ;;  %v1955_v41 = vpop.f32.mrb[39].mxu0  ;;  %v1996_v42 = vpop.f32.mrb[39].mxu1  ;;  %v4164_v24 = vld [vmem:[#allocation2 + $0x308] ss:$16 sps:$4 sm:$0xff]   ;;  %v4169_v25 = vld [vmem:[#allocation2 + $0x324] ss:$16 sps:$4 sm:$0xff]  }
0x173e   :  { %v2025_v39 = vadd.f32 %v2011_v28, %v1999_v34  ;;  %v2027_v50 = vadd.f32 %v2019_v29, %v2001_v35  ;;  %v4167_v27 = vld [vmem:[#allocation2 + $0x320] ss:$16 sps:$4 sm:$0xff]   ;;  %v4170_v28 = vld [vmem:[#allocation2 + $0x328] ss:$16 sps:$4 sm:$0xff]   ;;  %v4175_v29 = vld [vmem:[#allocation2 + $0x344] ss:$16 sps:$4 sm:$0xff]  }
0x173f   :  { %v2028_v43 = vmax.f32 %v2024_v1, 0.0  ;;  %v4178_v30 = vld [vmem:[#allocation2 + $0x34c] ss:$16 sps:$4 sm:$0xff]   ;;  %v4173_v31 = vld [vmem:[#allocation2 + $0x340] ss:$16 sps:$4 sm:$0xff]  }
0x1740   :  { %v2029_v44 = vmax.f32 %v2025_v39, 0.0  ;;  %v2031_v38 = vmax.f32 %v2027_v50, 0.0  ;;  %v4176_v32 = vld [vmem:[#allocation2 + $0x348] ss:$16 sps:$4 sm:$0xff]   ;;  %v4181_v33 = vld [vmem:[#allocation2 + $0x364] ss:$16 sps:$4 sm:$0xff]  }
0x1741   :  { %v2032_v47 = vpack.c.bf16 %v2028_v43, %v2028_v43  ;;  %v4184_v34 = vld [vmem:[#allocation2 + $0x36c] ss:$16 sps:$4 sm:$0xff]   ;;  %v4179_v35 = vld [vmem:[#allocation2 + $0x360] ss:$16 sps:$4 sm:$0xff]   ;;  %v4182_v36 = vld [vmem:[#allocation2 + $0x368] ss:$16 sps:$4 sm:$0xff]  }
0x1742   :  { %v2033_v45 = vpack.c.bf16 %v2029_v44, %v2029_v44  ;;  %v2035_v48 = vpack.c.bf16 %v2031_v38, %v2031_v38  ;;  %v4187_v37 = vld [vmem:[#allocation2 + $0x384] ss:$16 sps:$4 sm:$0xff]   ;;  %v4190_v1 = vld [vmem:[#allocation2 + $0x38c] ss:$16 sps:$4 sm:$0xff]   ;;  %v4185_v41 = vld [vmem:[#allocation2 + $0x380] ss:$16 sps:$4 sm:$0xff]  }
0x1743   :  { %v4188_v42 = vld [vmem:[#allocation2 + $0x388] ss:$16 sps:$4 sm:$0xff]   ;;  %v4193_v39 = vld [vmem:[#allocation2 + $0x3a4] ss:$16 sps:$4 sm:$0xff]   ;;  %v4196_v50 = vld [vmem:[#allocation2 + $0x3ac] ss:$16 sps:$4 sm:$0xff]  }
0x1744   :  { %2858 = vmatprep.mubr.bf16.mxu0 %v2033_v45  ;;  %2940 = vmatprep.mubr.bf16.mxu1 %v2033_v45  ;;  %v4191_v43 = vld [vmem:[#allocation2 + $0x3a0] ss:$16 sps:$4 sm:$0xff]   ;;  %v4194_v44 = vld [vmem:[#allocation2 + $0x3a8] ss:$16 sps:$4 sm:$0xff]   ;;  %v4199_v38 = vld [vmem:[#allocation2 + $0x3c4] ss:$16 sps:$4 sm:$0xff]  }
0x1745   :  { %2859 = vmatmul.mubr.bf16.vlgmr.msra.gmra.mrb[40].mxu0 %v2032_v47  ;;  %2941 = vmatmul.mubr.bf16.vlgmr.msra.gmra.mrb[40].mxu1 %v2032_v47  ;;  %v4202_v45 = vld [vmem:[#allocation2 + $0x3cc] ss:$16 sps:$4 sm:$0xff]   ;;  %v4205_v47 = vld [vmem:[#allocation2 + $0x3e4] ss:$16 sps:$4 sm:$0xff]  }
0x1746   :  { %2868 = vmatpush1.bf16.msra.mxu0 %v4113_v5  ;;  %2950 = vmatpush1.bf16.msra.mxu1 %v4116_v46  ;;  %v4197_v5 = vld [vmem:[#allocation2 + $0x3c0] ss:$16 sps:$4 sm:$0xff]   ;;  %v4200_v46 = vld [vmem:[#allocation2 + $0x3c8] ss:$16 sps:$4 sm:$0xff]  }
0x1747   :  { %2899 = vmatprep.mubr.bf16.mxu0 %v2035_v48  ;;  %2981 = vmatprep.mubr.bf16.mxu1 %v2035_v48  ;;  %v4206_v48 = vld [vmem:[#allocation2 + $0x3e8] ss:$16 sps:$4 sm:$0xff]  }
0x1748   :  { %2869 = vmatprep.subr.bf16.mxu0 %v4121_v0  ;;  %2951 = vmatprep.subr.bf16.mxu1 %v4124_v7  ;;  %v4208_v0 = vld [vmem:[#allocation2 + $0x3ec] ss:$16 sps:$4 sm:$0xff]   ;;  %v4203_v7 = vld [vmem:[#allocation2 + $0x3e0] ss:$16 sps:$4 sm:$0xff]  }
0x174a   :  { %2870 = vmatpush1.bf16.msra.mxu0 %v4119_v49  ;;  %2952 = vmatpush1.bf16.msra.mxu1 %v4122_v51  ;;  %v2030_v49 = vmax.f32 %v4929_v40, 0.0  ;;  %v4209_v51 = vld [vmem:[%s5057_s6 + $0x40] sm:$0xff]  }
0x174b   :  { %2871 = vmatprep.subr.bf16.mxu0 %v4127_v52  ;;  %2953 = vmatprep.subr.bf16.mxu1 %v4130_v53  ;;  %v4210_v52 = vld [vmem:[%s5057_s6 + $0xc0] sm:$0xff]  }
0x174c   :  { %v4211_v53 = vld [vmem:[%s5057_s6] sm:$0xff]  }
0x174d   :  { %v4212_v40 = vld [vmem:[%s5057_s6 + $0x80] sm:$0xff]  }
0x174e   :  { %2872 = vmatpush1.bf16.msra.mxu0 %v4125_v54  ;;  %2954 = vmatpush1.bf16.msra.mxu1 %v4128_v55  ;;  %v2034_v54 = vpack.c.bf16 %v2030_v49, %v2030_v49  ;;  %v4213_v55 = vld [vmem:[%s5057_s6 + $0x48] sm:$0xff]  }
0x174f   :  { %2873 = vmatprep.subr.bf16.mxu0 %v4133_v56  ;;  %2955 = vmatprep.subr.bf16.mxu1 %v4136_v57  ;;  %v4214_v56 = vld [vmem:[%s5057_s6 + $0xc8] sm:$0xff]  }
0x1750   :  { %v4215_v57 = vld [vmem:[%s5057_s6 + $0x8] sm:$0xff]  }
0x1752   :  { %2874 = vmatpush1.bf16.msra.mxu0 %v4131_v58  ;;  %2956 = vmatpush1.bf16.msra.mxu1 %v4134_v59  ;;  %v4216_v58 = vld [vmem:[%s5057_s6 + $0x88] sm:$0xff]   ;;  %v4217_v59 = vld [vmem:[%s5057_s6 + $0x50] sm:$0xff]  }
0x1753   :  { %2875 = vmatprep.subr.bf16.mxu0 %v4139_v60  ;;  %2957 = vmatprep.subr.bf16.mxu1 %v4142_v61  ;;  %v4218_v60 = vld [vmem:[%s5057_s6 + $0xd0] sm:$0xff]  }
0x1754   :  { %v4219_v61 = vld [vmem:[%s5057_s6 + $0x10] sm:$0xff]  }
0x1756   :  { %2876 = vmatpush1.bf16.msra.mxu0 %v4137_v62  ;;  %2958 = vmatpush1.bf16.msra.mxu1 %v4140_v63  ;;  %v4220_v62 = vld [vmem:[%s5057_s6 + $0x90] sm:$0xff]   ;;  %v4221_v63 = vld [vmem:[%s5057_s6 + $0x58] sm:$0xff]  }
0x1757   :  { %2877 = vmatprep.subr.bf16.mxu0 %v4145_v2  ;;  %2959 = vmatprep.subr.bf16.mxu1 %v4148_v3  ;;  %v4222_v2 = vld [vmem:[%s5057_s6 + $0xd8] sm:$0xff]  }
0x1758   :  { %v4223_v3 = vld [vmem:[%s5057_s6 + $0x18] sm:$0xff]  }
0x175a   :  { %2878 = vmatpush1.bf16.msra.mxu0 %v4143_v4  ;;  %2960 = vmatpush1.bf16.msra.mxu1 %v4146_v6  ;;  %v4224_v4 = vld [vmem:[%s5057_s6 + $0x98] sm:$0xff]   ;;  %v4225_v6 = vld [vmem:[%s5057_s6 + $0x60] sm:$0xff]  }
0x175b   :  { %2879 = vmatprep.subr.bf16.mxu0 %v4151_v8  ;;  %2961 = vmatprep.subr.bf16.mxu1 %v4154_v9  ;;  %v4226_v8 = vld [vmem:[%s5057_s6 + $0xe0] sm:$0xff]  }
0x175c   :  { %v4227_v9 = vld [vmem:[%s5057_s6 + $0x20] sm:$0xff]  }
0x175e   :  { %2880 = vmatpush1.bf16.msra.mxu0 %v4149_v10  ;;  %2962 = vmatpush1.bf16.msra.mxu1 %v4152_v11  ;;  %v4228_v10 = vld [vmem:[%s5057_s6 + $0xa0] sm:$0xff]   ;;  %v4229_v11 = vld [vmem:[%s5057_s6 + $0x68] sm:$0xff]  }
0x175f   :  { %2881 = vmatprep.subr.bf16.mxu0 %v4157_v12  ;;  %2963 = vmatprep.subr.bf16.mxu1 %v4160_v13  ;;  %v4230_v12 = vld [vmem:[%s5057_s6 + $0xe8] sm:$0xff]  }
0x1760   :  { %v4231_v13 = vld [vmem:[%s5057_s6 + $0x28] sm:$0xff]  }
0x1762   :  { %2882 = vmatpush1.bf16.msra.mxu0 %v4155_v14  ;;  %2964 = vmatpush1.bf16.msra.mxu1 %v4158_v15  ;;  %v4232_v14 = vld [vmem:[%s5057_s6 + $0xa8] sm:$0xff]   ;;  %v4233_v15 = vld [vmem:[%s5057_s6 + $0x70] sm:$0xff]  }
0x1763   :  { %2883 = vmatprep.subr.bf16.mxu0 %v4163_v16  ;;  %2965 = vmatprep.subr.bf16.mxu1 %v4166_v17  ;;  %v4234_v16 = vld [vmem:[%s5057_s6 + $0xf0] sm:$0xff]  }
0x1764   :  { %v4235_v17 = vld [vmem:[%s5057_s6 + $0x30] sm:$0xff]  }
0x1766   :  { %2884 = vmatpush1.bf16.msra.mxu0 %v4161_v21  ;;  %2966 = vmatpush1.bf16.msra.mxu1 %v4164_v24  ;;  %v4236_v21 = vld [vmem:[%s5057_s6 + $0xb0] sm:$0xff]   ;;  %v4237_v24 = vld [vmem:[%s5057_s6 + $0x78] sm:$0xff]  }
0x1767   :  { %2885 = vmatprep.subr.bf16.mxu0 %v4169_v25  ;;  %2967 = vmatprep.subr.bf16.mxu1 %v4172_v26  ;;  %v4238_v25 = vld [vmem:[%s5057_s6 + $0xf8] sm:$0xff]  }
0x1768   :  { %v4239_v26 = vld [vmem:[%s5057_s6 + $0x38] sm:$0xff]  }
0x176a   :  { %2886 = vmatpush1.bf16.msra.mxu0 %v4167_v27  ;;  %2968 = vmatpush1.bf16.msra.mxu1 %v4170_v28  ;;  %v4240_v27 = vld [vmem:[%s5057_s6 + $0xb8] sm:$0xff]   ;;  %v2164_v28 = vld [vmem:[#allocation5] sm:$0xf] }
0x176b   :  { %2887 = vmatprep.subr.bf16.mxu0 %v4175_v29  ;;  %2969 = vmatprep.subr.bf16.mxu1 %v4178_v30  ;;  %v2169_v29 = vrot.slane %v2164_v28, %v2006_v19  ;;  %v2177_v30 = vrot.slane %v2164_v28, %v2014_v20 }
0x176e   :  { %2888 = vmatpush1.bf16.msra.mxu0 %v4173_v31  ;;  %2970 = vmatpush1.bf16.msra.mxu1 %v4176_v32  ;;  %v2173_v31 = vrot.slane %v2164_v28, %v2010_v22  ;;  %v2181_v32 = vrot.slane %v2164_v28, %v2018_v23 }
0x176f   :  { %2889 = vmatprep.subr.bf16.mxu0 %v4181_v33  ;;  %2971 = vmatprep.subr.bf16.mxu1 %v4184_v34 }
0x1772   :  { %2890 = vmatpush1.bf16.msra.mxu0 %v4179_v35  ;;  %2972 = vmatpush1.bf16.msra.mxu1 %v4182_v36 }
0x1773   :  { %2891 = vmatprep.subr.bf16.mxu0 %v4187_v37  ;;  %2973 = vmatprep.subr.bf16.mxu1 %v4190_v1 }
0x1776   :  { %2892 = vmatpush1.bf16.msra.mxu0 %v4185_v41  ;;  %2974 = vmatpush1.bf16.msra.mxu1 %v4188_v42 }
0x1777   :  { %2893 = vmatprep.subr.bf16.mxu0 %v4193_v39  ;;  %2975 = vmatprep.subr.bf16.mxu1 %v4196_v50 }
0x177a   :  { %2894 = vmatpush1.bf16.msra.mxu0 %v4191_v43  ;;  %2976 = vmatpush1.bf16.msra.mxu1 %v4194_v44 }
0x177b   :  { %2895 = vmatprep.subr.bf16.mxu0 %v4199_v38  ;;  %2977 = vmatprep.subr.bf16.mxu1 %v4202_v45 }
0x177e   :  { %2896 = vmatpush1.bf16.msra.mxu0 %v4197_v5  ;;  %2978 = vmatpush1.bf16.msra.mxu1 %v4200_v46 }
0x177f   :  { %2897 = vmatprep.subr.bf16.mxu0 %v4205_v47  ;;  %2979 = vmatprep.subr.bf16.mxu1 %v4208_v0  ;;  %v3645_v0 = vld [vmem:[%s5058_s7] ss:$0 sm:$0xff] }
0x1782   :  { %2898 = vmatpush1.bf16.msra.mxu0 %v4203_v7  ;;  %2980 = vmatpush1.bf16.msra.mxu1 %v4206_v48 }
0x1783   :  { %3718 = vmatprep.subr.bf16.mxu0 %v4209_v51  ;;  %3740 = vmatprep.subr.bf16.mxu1 %v4210_v52 }
0x1785   :  { %2900 = vmatmul.mubr.bf16.vlgmr.msra.gmra.mrb[40].mxu0 %v2034_v54  ;;  %2982 = vmatmul.mubr.bf16.vlgmr.msra.gmra.mrb[40].mxu1 %v2034_v54 }
0x1786   :  { %3719 = vmatpush3.bf16.msra.mxu0 %v4211_v53  ;;  %3741 = vmatpush3.bf16.msra.mxu1 %v4212_v40 }
0x1787   :  { %3720 = vmatprep.subr.bf16.mxu0 %v4213_v55  ;;  %3742 = vmatprep.subr.bf16.mxu1 %v4214_v56 }
0x178a   :  { %3721 = vmatpush3.bf16.msra.mxu0 %v4215_v57  ;;  %3743 = vmatpush3.bf16.msra.mxu1 %v4216_v58 }
0x178b   :  { %3722 = vmatprep.subr.bf16.mxu0 %v4217_v59  ;;  %3744 = vmatprep.subr.bf16.mxu1 %v4218_v60 }
0x178e   :  { %3723 = vmatpush3.bf16.msra.mxu0 %v4219_v61  ;;  %3745 = vmatpush3.bf16.msra.mxu1 %v4220_v62 }
0x178f   :  { %3724 = vmatprep.subr.bf16.mxu0 %v4221_v63  ;;  %3746 = vmatprep.subr.bf16.mxu1 %v4222_v2 }
0x1792   :  { %3725 = vmatpush3.bf16.msra.mxu0 %v4223_v3  ;;  %3747 = vmatpush3.bf16.msra.mxu1 %v4224_v4 }
0x1793   :  { %3726 = vmatprep.subr.bf16.mxu0 %v4225_v6  ;;  %3748 = vmatprep.subr.bf16.mxu1 %v4226_v8 }
0x1796   :  { %3727 = vmatpush3.bf16.msra.mxu0 %v4227_v9  ;;  %3749 = vmatpush3.bf16.msra.mxu1 %v4228_v10 }
0x1797   :  { %3728 = vmatprep.subr.bf16.mxu0 %v4229_v11  ;;  %3750 = vmatprep.subr.bf16.mxu1 %v4230_v12 }
0x179a   :  { %3729 = vmatpush3.bf16.msra.mxu0 %v4231_v13  ;;  %3751 = vmatpush3.bf16.msra.mxu1 %v4232_v14 }
0x179b   :  { %3730 = vmatprep.subr.bf16.mxu0 %v4233_v15  ;;  %3752 = vmatprep.subr.bf16.mxu1 %v4234_v16 }
0x179e   :  { %3731 = vmatpush3.bf16.msra.mxu0 %v4235_v17  ;;  %3753 = vmatpush3.bf16.msra.mxu1 %v4236_v21 }
0x179f   :  { %3732 = vmatprep.subr.bf16.mxu0 %v4237_v24  ;;  %3754 = vmatprep.subr.bf16.mxu1 %v4238_v25 }
0x17a2   :  { %3733 = vmatpush3.bf16.msra.mxu0 %v4239_v26  ;;  %3755 = vmatpush3.bf16.msra.mxu1 %v4240_v27 }
0x1858   :  { %v2901_v33 = vpop.f32.mrb[40].mxu0  ;;  %v2983_v34 = vpop.f32.mrb[40].mxu1 }
0x1859   :  { %v3898_v35 = vadd.f32 %v2901_v33, %v2169_v29  ;;  %v3900_v36 = vadd.f32 %v2983_v34, %v2177_v30  ;;  %v2903_v37 = vpop.f32.mrb[41].mxu0  ;;  %v2985_v1 = vpop.f32.mrb[41].mxu1 }
0x185a   :  { %v3899_v41 = vadd.f32 %v2903_v37, %v2173_v31  ;;  %v3901_v42 = vadd.f32 %v2985_v1, %v2181_v32  ;;  %v2905_v39 = vpop.f32.mrb[42].mxu0  ;;  %v2987_v50 = vpop.f32.mrb[42].mxu1 }
0x185b   :  { %v2990_v19 = vmax.f32 %v3898_v35, 0.0  ;;  %v2992_v43 = vmax.f32 %v3900_v36, 0.0  ;;  %v2906_v44 = vpop.f32.mrb[43].mxu0  ;;  %v2988_v20 = vpop.f32.mrb[43].mxu1 }
0x185c   :  { %v2991_v38 = vmax.f32 %v3899_v41, 0.0  ;;  %v2993_v45 = vmax.f32 %v3901_v42, 0.0 }
0x185d   :  { %v2994_v18 = vpack.c.bf16 %v2990_v19, %v2990_v19  ;;  %v2996_v23 = vpack.c.bf16 %v2992_v43, %v2992_v43 }
0x185e   :  { %v2995_v22 = vpack.c.bf16 %v2991_v38, %v2991_v38  ;;  %v2997_v5 = vpack.c.bf16 %v2993_v45, %v2993_v45 }
0x1860   :  { %3293 = vmatprep.mubr.bf16.mxu0 %v2995_v22  ;;  %3333 = vmatprep.mubr.bf16.mxu1 %v2997_v5 }
0x1861   :  { %3294 = vmatmul.mubr.bf16.vlgmr.msra.gmra.mrb[44].mxu0 %v2994_v18  ;;  %3334 = vmatmul.mubr.bf16.vlgmr.msra.gmra.mrb[44].mxu1 %v2996_v23 }
0x1934   :  { %v3734_v46 = vpop.f32.mrb[44].mxu0  ;;  %v3756_v47 = vpop.f32.mrb[44].mxu1 }
0x1935   :  { %v3735_v7 = vpop.f32.mrb[45].mxu0  ;;  %v3757_v48 = vpop.f32.mrb[45].mxu1 }
0x1936   :  { %v3736_v49 = vadd.f32 %v3735_v7, %v3734_v46  ;;  %v3758_v51 = vadd.f32 %v3757_v48, %v3756_v47  ;;  %v3737_v52 = vpop.f32.mrb[46].mxu0  ;;  %v3759_v53 = vpop.f32.mrb[46].mxu1 }
0x1937   :  { %v3738_v40 = vpop.f32.mrb[47].mxu0  ;;  %v3760_v54 = vpop.f32.mrb[47].mxu1 }
0x1938   :  { %v3296_v55 = vadd.f32 %v3736_v49, %v3645_v0 }
0x193a   :  { %v3336_v56 = vadd.f32 %v3758_v51, %v3296_v55 }
0x193c   :  { %3342 = vst.msk [vmem:[#allocation7] sm:$0x3] %vm3341_vm2, %v3336_v56 }
0x193d   :  { %4360 = shalt.err (!%p4357_p6)
}
0x193e   :  { %s4361_s30 = scalar_lea.hbm %s5059_s8, 32 }
0x193f   :  { %p4362_p7 = scmp.ne.s32.totalorder %s5059_s8, %s4361_s30  ;;  %p4365_p8 = scmp.lt.u32.totalorder %s4361_s30, %s5059_s8 }
0x1941   :  { %p4367_p9 = pnand %p4365_p8, %p4362_p7 }
0x1943   :  { %4370 = shalt.err (!%p4367_p9)
}
0x1944   :  { %3352 = dma.vmem_to_hbm [thread:$0]  %s3350_s0, 32, %s5059_s8, [#allocation4]  }
0x1945   :  { %4375 = dma.done.wait [#allocation4], 32  }
0x1946   :  { %4376 = vsyncadd [#allocation4], 4294967264 }
0x1947   :  { %3356 = vsyncpa [#allocation3], 1 }
0x1948   :  { %3357 = vsyncpa [#allocation6], 1 }
0x1949   :  { %3358 = vsyncpa [#allocation4], 1 }

</bundles_post_ra>
